<compile_context>
chip_gen: v7x
topology: tpu7x:2x2x1
jax: 0.10.0
libtpu: 0.0.40
codegen_flags: <defaults>
</compile_context>

<pallas_src>
import functools
import math

import numpy as np

import jax
import jax.numpy as jnp
from jax.experimental import pallas as pl
from jax.experimental.pallas import tpu as pltpu

_EPS = 1e-6  # RMSNorm() in the reference takes no args -> weightless, eps=1e-6.


def _sigmoid(x):
    # numerically stable logistic with a single transcendental (EUP) push
    e = jnp.exp(-jnp.abs(x))
    return jnp.where(x >= 0, 1.0, e) / (1.0 + e)


def _silu(x):
    return x * _sigmoid(x)


def _softplus(x):
    return jnp.maximum(x, 0.0) + jnp.log(1.0 + jnp.exp(-jnp.abs(x)))


def _round8(n):
    return -(-n // 8) * 8


def _wp_layout(D, Dh, N, K):
    """Row layout of the packed (rows, 128) weight buffer.

    Every block starts at a sublane-aligned (multiple-of-8) row offset so the
    static ref slices in the kernel are aligned loads.
    """
    lay, off = {}, 0
    for name, rows, cols in (
        ("w_in",   D,      2 * Dh),      # [x_proj | x_res_proj]
        ("w_conv", K * Dh, Dh),          # K conv taps stacked on contraction
        ("w_s",    Dh,     Dh + 2 * N),  # [w_s_dt @ w_dt | w_s_B | w_s_C]
        ("w_out",  Dh,     D),
        ("bias",   8,      128),         # rows: b_xp, b_conv, b_dt, Dd, b_out
    ):
        lay[name] = (off, rows, cols)
        off += _round8(rows)
    lay["_rows"] = off
    return lay


# -----------------------------------------------------------------------------
# Kernel
# -----------------------------------------------------------------------------
def _mamba_kernel(x_ref, wp_ref, wq_ref, es_ref, o_ref, *, L, D, Dh, N, K, lay):
    f32 = jnp.float32
    Bb = x_ref.shape[0]
    R = Bb * L
    DhN = Dh * N

    def wp(name):
        o, r, c = lay[name]
        return wp_ref[o:o + r, 0:c]

    bo = lay["bias"][0]
    bias_blk = wp_ref[bo:bo + 8, :]          # one aligned (8,128) load
    b_xp = bias_blk[0:1, 0:Dh]
    b_cv = bias_blk[1:2, 0:Dh]
    b_dt = bias_blk[2:3, 0:Dh]
    dd = bias_blk[3:4, 0:Dh]
    b_out = bias_blk[4:5, 0:D]

    # flatten the batch block to (Bb*L, D) rows so every matmul sees Bb*L rows
    x = x_ref[...].reshape(R, D).astype(f32)

    # ---- RMSNorm (weightless) ----
    ms = jnp.mean(x * x, axis=-1, keepdims=True)
    xn = x * jax.lax.rsqrt(ms + _EPS)

    # ---- fused input projection: one matmul for x_proj and x_res_proj ----
    proj = jnp.dot(xn, wp("w_in"), preferred_element_type=f32)   # (R, 2Dh)
    u = proj[:, :Dh] + b_xp                                      # (R, Dh)
    res = _silu(proj[:, Dh:])                                    # (R, Dh)

    # ---- causal Conv1d(kernel=K, padding=K-1), output truncated to L ----
    # TODO(synk): reference applies Conv1d(d_in,d_in) with no transpose /
    # truncation; implemented as the standard causal sequence conv (valid
    # because d_in == d_hidden in this config).
    # The K time-shifted copies are built purely in vregs (zero-pad once +
    # static slices + lane concat); no VMEM scratch, no masked sub-tile stores.
    u3 = u.reshape(Bb, L, Dh)
    u_pad = jnp.concatenate(
        [jnp.zeros((Bb, K - 1, Dh), f32), u3], axis=1)           # (Bb, L+K-1, Dh)
    u_stack = jnp.concatenate(
        [u_pad[:, j:j + L, :] for j in range(K)], axis=-1)       # (Bb, L, K*Dh)
    conv = jnp.dot(u_stack.reshape(R, K * Dh), wp("w_conv"),
                   preferred_element_type=f32) + b_cv
    main = _silu(conv)                                           # (R, Dh)

    # ---- fused S4 projection: [delta (low-rank folded) | B | C] ----
    sproj = jnp.dot(main, wp("w_s"), preferred_element_type=f32)
    delta = _softplus(sproj[:, :Dh] + b_dt)                      # (R, Dh)
    Bm = sproj[:, Dh:Dh + N]                                     # (R, N)
    Cm = sproj[:, Dh + N:Dh + 2 * N]                             # (R, N)

    # ---- lane-dense (R, Dh*N) expansions via 0/1 selector matmuls --------
    # (the MXU is idle here; A is folded into its selector so the whole Ad
    # tensor comes from a single exp train instead of L dribbles)
    e_a = wq_ref[0:Dh, :]            # (Dh, DhN): e_a[d, d*N+n]   = A[d, n]
    e_dup = wq_ref[Dh:2 * Dh, :]     # (Dh, DhN): e_dup[d, d*N+n] = 1
    e_til = wq_ref[2 * Dh:2 * Dh + N, :]  # (N, DhN): e_til[n, d*N+n] = 1

    Ad = jnp.exp(jnp.dot(delta, e_a, preferred_element_type=f32))      # (R, DhN)
    dbu_w = jnp.dot(delta * main, e_dup, preferred_element_type=f32)   # (R, DhN)
    B_w = jnp.dot(Bm, e_til, preferred_element_type=f32)               # (R, DhN)
    C_w = jnp.dot(Cm, e_til, preferred_element_type=f32)               # (R, DhN)
    Bx = dbu_w * B_w                                                   # (R, DhN)

    # ---- selective scan: sequential over L, state carried as (Bb, Dh*N) ----
    Ad3 = Ad.reshape(Bb, L, DhN)
    Bx3 = Bx.reshape(Bb, L, DhN)
    Cw3 = C_w.reshape(Bb, L, DhN)
    h = jnp.zeros((Bb, DhN), f32)
    hc = []
    for t in range(L):
        h = Ad3[:, t, :] * h + Bx3[:, t, :]
        hc.append(h * Cw3[:, t, :])          # y reduction hoisted out of loop
    hc = jnp.stack(hc, axis=1).reshape(R, DhN)                         # (R, DhN)

    # hoisted y reduction: one matmul against a 0/1 block-diagonal selector
    y = jnp.dot(hc, es_ref[...], preferred_element_type=f32)           # (R, Dh)

    # TODO(synk): original S4 declares D = ones(d_in, d_in) with a broken
    # broadcast; implemented as the standard per-channel skip y + x * D.
    y = y + main * dd

    # ---- gate, output projection, residual ----
    gated = y * res
    out = jnp.dot(gated, wp("w_out"), preferred_element_type=f32) + b_out + x
    o_ref[...] = out.reshape(Bb, L, D).astype(o_ref.dtype)


# -----------------------------------------------------------------------------
# One-time weight fusion / packing (hoisted out of the forward path)
# -----------------------------------------------------------------------------
def pack_params(p):
    """Fuse + pack all weights once.  Returns the 3 packed device buffers."""
    K, d_ci, d_co = p["w_conv"].shape
    D, Dh = p["w_xproj"].shape
    N = p["A"].shape[1]
    DhN = Dh * N
    assert D == Dh == d_ci == d_co
    assert Dh % 8 == 0 and N % 8 == 0 and DhN % 128 == 0
    assert 2 * Dh <= 128 and Dh + 2 * N <= 128

    lay = _wp_layout(D, Dh, N, K)
    wp = np.zeros((lay["_rows"], 128), np.float32)

    def put(name, val):
        o, r, c = lay[name]
        wp[o:o + r, :c] = np.asarray(val, np.float32)

    # [x_proj | x_res_proj] share the input xn -> one (D, 2*Dh) matmul.
    put("w_in", np.concatenate([np.asarray(p["w_xproj"]),
                                np.asarray(p["w_res"])], axis=1))
    # per-tap conv matrices stacked along the contraction dim -> (K*Dh, Dh).
    put("w_conv", np.asarray(p["w_conv"]).reshape(K * d_ci, d_co))
    # no nonlinearity between w_s_dt and w_dt -> fold, then concat with B/C.
    w_dt_full = np.asarray(p["w_s_dt"]) @ np.asarray(p["w_dt"])
    put("w_s", np.concatenate([w_dt_full, np.asarray(p["w_s_B"]),
                               np.asarray(p["w_s_C"])], axis=1))
    put("w_out", np.asarray(p["w_out"]))
    bo = lay["bias"][0]
    wp[bo + 0, 0:Dh] = np.asarray(p["b_xproj"])[0]
    wp[bo + 1, 0:Dh] = np.asarray(p["b_conv"])[0]
    wp[bo + 2, 0:Dh] = np.asarray(p["b_dt"])[0]
    wp[bo + 3, 0:Dh] = np.asarray(p["Dd"])[0]
    wp[bo + 4, 0:D] = np.asarray(p["b_out"])[0]

    # selector constants for the lane-dense scan layout (flat index = d*N + n)
    d_of = np.arange(DhN) // N
    n_of = np.arange(DhN) % N
    e_dup = (np.arange(Dh)[:, None] == d_of[None, :]).astype(np.float32)
    e_til = (np.arange(N)[:, None] == n_of[None, :]).astype(np.float32)
    e_a = e_dup * np.asarray(p["A"], np.float32).reshape(1, DhN)
    wq = np.concatenate([e_a, e_dup, e_til], axis=0)
    pad = (-wq.shape[0]) % 8
    if pad:
        wq = np.concatenate([wq, np.zeros((pad, DhN), np.float32)], axis=0)
    es = np.ascontiguousarray(e_dup.T)               # (DhN, Dh) 0/1 group-sum

    return {
        "wp": jnp.asarray(wp),
        "wq": jnp.asarray(wq),
        "es": jnp.asarray(es),
        "D": D, "Dh": Dh, "N": N, "K": K,
    }


def _default_num_blocks(batch):
    """2 'parallel' grid steps only where a second TensorCore can take them."""
    if batch < 2 or batch % 2 != 0:
        return 1
    # prefer the hardware query; fall back to the device-kind string.
    try:
        info = pltpu.get_tpu_info()
        for attr in ("num_cores", "core_count", "num_tensor_cores",
                     "tensorcore_count"):
            v = getattr(info, attr, None)
            if isinstance(v, int) and v >= 2:
                return 2
            if isinstance(v, int) and v == 1:
                return 1
    except Exception:
        pass
    try:
        kind = jax.devices()[0].device_kind.lower()
        if "7" in kind:          # v7x: 2 TensorCores per chip
            return 2
    except Exception:
        pass
    return 1                     # v5e/v6e: single TC -> avoid extra per-step cost


# -----------------------------------------------------------------------------
# Wrapper: nothing here but the pallas_call (weight prep is in pack_params)
# -----------------------------------------------------------------------------
def mamba_block_pallas(x, packed, num_blocks=None):
    B, L, D = x.shape
    Dh, N, K = packed["Dh"], packed["N"], packed["K"]
    assert D == packed["D"]
    if num_blocks is None:
        num_blocks = _default_num_blocks(B)
    assert B % num_blocks == 0
    Bb = B // num_blocks
    lay = _wp_layout(D, Dh, N, K)

    kernel = functools.partial(_mamba_kernel, L=L, D=D, Dh=Dh, N=N, K=K, lay=lay)

    wp, wq, es = packed["wp"], packed["wq"], packed["es"]

    def rep(a):
        nd = a.ndim
        return pl.BlockSpec(a.shape, lambda b, _nd=nd: (0,) * _nd)

    # NOTE: total VMEM (4 inputs + output, double buffered) < 1 MiB, far under
    # every generation's scoped default -> no vmem_limit_bytes override.
    return pl.pallas_call(
        kernel,
        out_shape=jax.ShapeDtypeStruct((B, L, D), x.dtype),
        grid=(num_blocks,),
        in_specs=[
            pl.BlockSpec((Bb, L, D), lambda b: (b, 0, 0)),
            rep(wp), rep(wq), rep(es),
        ],
        out_specs=pl.BlockSpec((Bb, L, D), lambda b: (b, 0, 0)),
        compiler_params=pltpu.CompilerParams(dimension_semantics=("parallel",)),
    )(x, wp, wq, es)


# -----------------------------------------------------------------------------
# Parameter init + pure-JAX reference (unfused math) for validation
# -----------------------------------------------------------------------------
def init_params(key, d_in, d_hidden, d_ssm, dt_rank, n_conv):
    # The module's own x_res_proj / Conv1d shapes only type-check if d_in == d_hidden.
    assert d_in == d_hidden
    ks = jax.random.split(key, 10)

    def uniform(k, shape, fan_in):
        bound = 1.0 / math.sqrt(fan_in)
        return jax.random.uniform(k, shape, jnp.float32, -bound, bound)

    p = {}
    p["w_xproj"] = uniform(ks[0], (d_in, d_hidden), d_in)
    p["b_xproj"] = uniform(ks[1], (1, d_hidden), d_in)
    # Conv1d(d_in, d_in, n_conv, padding=n_conv-1) stored as per-tap (in, out).
    p["w_conv"] = uniform(ks[2], (n_conv, d_in, d_in), d_in * n_conv)
    p["b_conv"] = uniform(ks[3], (1, d_in), d_in * n_conv)
    p["w_res"] = uniform(ks[4], (d_hidden, d_hidden), d_hidden)
    p["w_out"] = uniform(ks[5], (d_hidden, d_in), d_hidden)
    p["b_out"] = uniform(ks[6], (1, d_in), d_hidden)
    # S4.x_proj: Linear(d_hidden, 2*d_ssm + dt_rank, bias=False), pre-split.
    # TODO(synk): the reference's split names are scrambled; standard Mamba
    # [dt | B | C] semantics are used.
    w_s = uniform(ks[7], (d_hidden, dt_rank + 2 * d_ssm), d_hidden)
    p["w_s_dt"] = w_s[:, :dt_rank]
    p["w_s_B"] = w_s[:, dt_rank:dt_rank + d_ssm]
    p["w_s_C"] = w_s[:, dt_rank + d_ssm:]
    p["w_dt"] = uniform(ks[8], (dt_rank, d_hidden), dt_rank)
    p["b_dt"] = uniform(ks[9], (1, d_hidden), dt_rank)
    # TODO(synk): triton generate_a is undefined; use deterministic S4D-real init.
    p["A"] = -jnp.broadcast_to(
        jnp.arange(1, d_ssm + 1, dtype=jnp.float32)[None, :], (d_hidden, d_ssm)
    )
    p["Dd"] = jnp.ones((1, d_hidden), jnp.float32)
    return p


def mamba_block_ref(x, p):
    """Pure-JAX reference with the original (unfused) math, for validation."""
    B, L, _ = x.shape
    ms = jnp.mean(x * x, axis=-1, keepdims=True)
    xn = x * jax.lax.rsqrt(ms + _EPS)
    u = xn @ p["w_xproj"] + p["b_xproj"]
    Dh = u.shape[-1]
    K = p["w_conv"].shape[0]
    u_pad = jnp.concatenate([jnp.zeros((B, K - 1, Dh), u.dtype), u], axis=1)
    conv = jnp.zeros((B, L, Dh), jnp.float32) + p["b_conv"]
    for j in range(K):
        conv = conv + jnp.einsum("bld,de->ble", u_pad[:, j:j + L, :], p["w_conv"][j])
    main = _silu(conv)
    res = _silu(xn @ p["w_res"])
    dt_low = main @ p["w_s_dt"]
    Bm = main @ p["w_s_B"]
    Cm = main @ p["w_s_C"]
    delta = _softplus(dt_low @ p["w_dt"] + p["b_dt"])
    Ad = jnp.exp(delta[..., None] * p["A"][None, None])
    Bx = delta[..., None] * Bm[:, :, None, :] * main[..., None]
    N = p["A"].shape[1]
    h = jnp.zeros((B, Dh, N), jnp.float32)
    ys = []
    for t in range(L):
        h = Ad[:, t] * h + Bx[:, t]
        ys.append(jnp.sum(h * Cm[:, t][:, None, :], axis=-1))
    y = jnp.stack(ys, axis=1)
    y = y + main * p["Dd"]
    gated = y * res
    out = gated @ p["w_out"] + p["b_out"]
    return out + x


if __name__ == "__main__":
    d_in = 32
    d_hidden = 32      # must equal d_in (see init_params)
    d_ssm_hidden = 16
    dt_rank = 8
    n_conv = 4
    batch, seq = 2, 8

    key = jax.random.PRNGKey(0)
    kx, kp = jax.random.split(key)
    x = jax.random.normal(kx, (batch, seq, d_in), jnp.float32)
    params = init_params(kp, d_in, d_hidden, d_ssm_hidden, dt_rank, n_conv)
    packed = pack_params(params)     # one-time fusion/packing (out of fwd path)

    out = jax.block_until_ready(mamba_block_pallas(x, packed))
    ref = mamba_block_ref(x, params)

    assert out.shape == (batch, seq, d_in)
    err = float(jnp.max(jnp.abs(out - ref)))
    assert jnp.allclose(out, ref, atol=1e-3, rtol=1e-3), err
    print("KERNEL_OK")
</pallas_src>

<mosaic_0001>
module attributes {stable_mosaic.version = 11 : i64} {
  func.func @_mamba_kernel(%arg0: i32, %arg1: memref<2x8x32xf32, #tpu.memory_space<vmem>>, %arg2: memref<232x128xf32, #tpu.memory_space<vmem>>, %arg3: memref<80x512xf32, #tpu.memory_space<vmem>>, %arg4: memref<512x32xf32, #tpu.memory_space<vmem>>, %arg5: memref<2x8x32xf32, #tpu.memory_space<vmem>>) attributes {dimension_semantics = [#tpu.dimension_semantics<parallel>], iteration_bounds = array<i64: 1>, scalar_prefetch = 0 : i64, scratch_operands = 0 : i64, tpu.core_type = #tpu.core_type<tc>, window_params = [{transform_indices = @transform_0, window_bounds = array<i64: 2, 8, 32>}, {pipeline_mode = #tpu.pipeline_mode<synchronous>, transform_indices = @transform_1, window_bounds = array<i64: 232, 128>}, {pipeline_mode = #tpu.pipeline_mode<synchronous>, transform_indices = @transform_2, window_bounds = array<i64: 80, 512>}, {pipeline_mode = #tpu.pipeline_mode<synchronous>, transform_indices = @transform_3, window_bounds = array<i64: 512, 32>}, {transform_indices = @transform_4, window_bounds = array<i64: 2, 8, 32>}]} {
    %c224 = arith.constant 224 : index
    %c0 = arith.constant 0 : index
    %0 = vector.load %arg2[%c224, %c0] : memref<232x128xf32, #tpu.memory_space<vmem>>, vector<8x128xf32>
    %1 = vector.extract_strided_slice %0 {offsets = [0, 0], sizes = [1, 32], strides = [1, 1]} : vector<8x128xf32> to vector<1x32xf32>
    %2 = vector.extract_strided_slice %0 {offsets = [1, 0], sizes = [1, 32], strides = [1, 1]} : vector<8x128xf32> to vector<1x32xf32>
    %3 = vector.extract_strided_slice %0 {offsets = [2, 0], sizes = [1, 32], strides = [1, 1]} : vector<8x128xf32> to vector<1x32xf32>
    %4 = vector.extract_strided_slice %0 {offsets = [3, 0], sizes = [1, 32], strides = [1, 1]} : vector<8x128xf32> to vector<1x32xf32>
    %5 = vector.extract_strided_slice %0 {offsets = [4, 0], sizes = [1, 32], strides = [1, 1]} : vector<8x128xf32> to vector<1x32xf32>
    %c0_0 = arith.constant 0 : index
    %c0_1 = arith.constant 0 : index
    %c0_2 = arith.constant 0 : index
    %6 = vector.load %arg1[%c0_0, %c0_1, %c0_2] : memref<2x8x32xf32, #tpu.memory_space<vmem>>, vector<2x8x32xf32>
    %7 = vector.shape_cast %6 : vector<2x8x32xf32> to vector<16x32xf32>
    %8 = arith.mulf %7, %7 : vector<16x32xf32>
    %cst = arith.constant dense<0.000000e+00> : vector<16xf32>
    %9 = vector.multi_reduction <add>, %8, %cst [1] : vector<16x32xf32> to vector<16xf32>
    %10 = vector.shape_cast %9 : vector<16xf32> to vector<16x1xf32>
    %cst_3 = arith.constant 3.200000e+01 : f32
    %11 = vector.broadcast %cst_3 : f32 to vector<16x1xf32>
    %12 = arith.divf %10, %11 : vector<16x1xf32>
    %cst_4 = arith.constant 9.99999997E-7 : f32
    %13 = vector.broadcast %cst_4 : f32 to vector<16x1xf32>
    %14 = arith.addf %12, %13 : vector<16x1xf32>
    %15 = math.rsqrt %14 : vector<16x1xf32>
    %16 = vector.broadcast %15 : vector<16x1xf32> to vector<16x32xf32>
    %17 = arith.mulf %7, %16 : vector<16x32xf32>
    %c0_5 = arith.constant 0 : index
    %c0_6 = arith.constant 0 : index
    %18 = vector.load %arg2[%c0_5, %c0_6] : memref<232x128xf32, #tpu.memory_space<vmem>>, vector<32x64xf32>
    %cst_7 = arith.constant dense<0.000000e+00> : vector<16x64xf32>
    %19 = tpu.matmul %17, %18, %cst_7 {dimension_numbers = #tpu.dot_dimension_numbers<[1], [0], [0], [1], [0, 0, 1, 1], [], []>} : vector<16x32xf32>, vector<32x64xf32>, vector<16x64xf32> -> vector<16x64xf32>
    %20 = vector.extract_strided_slice %19 {offsets = [0, 0], sizes = [16, 32], strides = [1, 1]} : vector<16x64xf32> to vector<16x32xf32>
    %21 = vector.broadcast %1 : vector<1x32xf32> to vector<16x32xf32>
    %22 = arith.addf %20, %21 : vector<16x32xf32>
    %23 = vector.extract_strided_slice %19 {offsets = [0, 32], sizes = [16, 32], strides = [1, 1]} : vector<16x64xf32> to vector<16x32xf32>
    %24 = math.absf %23 : vector<16x32xf32>
    %cst_8 = arith.constant 0.000000e+00 : f32
    %25 = vector.broadcast %cst_8 : f32 to vector<16x32xf32>
    %26 = arith.subf %25, %24 : vector<16x32xf32>
    %27 = math.exp %26 : vector<16x32xf32>
    %cst_9 = arith.constant 0.000000e+00 : f32
    %28 = vector.broadcast %cst_9 : f32 to vector<16x32xf32>
    %29 = arith.cmpf oge, %23, %28 : vector<16x32xf32>
    %cst_10 = arith.constant 1.000000e+00 : f32
    %30 = vector.broadcast %cst_10 : f32 to vector<16x32xf32>
    %31 = arith.select %29, %30, %27 : vector<16x32xi1>, vector<16x32xf32>
    %cst_11 = arith.constant 1.000000e+00 : f32
    %32 = vector.broadcast %cst_11 : f32 to vector<16x32xf32>
    %33 = arith.addf %32, %27 : vector<16x32xf32>
    %34 = arith.divf %31, %33 : vector<16x32xf32>
    %35 = arith.mulf %23, %34 : vector<16x32xf32>
    %36 = vector.shape_cast %22 : vector<16x32xf32> to vector<2x8x32xf32>
    %cst_12 = arith.constant 0.000000e+00 : f32
    %37 = vector.broadcast %cst_12 : f32 to vector<2x3x32xf32>
    %38 = tpu.concatenate %37, %36 in 1 : vector<2x3x32xf32>, vector<2x8x32xf32> -> vector<2x11x32xf32>
    %39 = vector.extract_strided_slice %38 {offsets = [0, 0, 0], sizes = [2, 8, 32], strides = [1, 1, 1]} : vector<2x11x32xf32> to vector<2x8x32xf32>
    %40 = vector.extract_strided_slice %38 {offsets = [0, 1, 0], sizes = [2, 8, 32], strides = [1, 1, 1]} : vector<2x11x32xf32> to vector<2x8x32xf32>
    %41 = vector.extract_strided_slice %38 {offsets = [0, 2, 0], sizes = [2, 8, 32], strides = [1, 1, 1]} : vector<2x11x32xf32> to vector<2x8x32xf32>
    %42 = vector.extract_strided_slice %38 {offsets = [0, 3, 0], sizes = [2, 8, 32], strides = [1, 1, 1]} : vector<2x11x32xf32> to vector<2x8x32xf32>
    %43 = tpu.concatenate %39, %40, %41, %42 in 2 : vector<2x8x32xf32>, vector<2x8x32xf32>, vector<2x8x32xf32>, vector<2x8x32xf32> -> vector<2x8x128xf32>
    %44 = vector.shape_cast %43 : vector<2x8x128xf32> to vector<16x128xf32>
    %c32 = arith.constant 32 : index
    %c0_13 = arith.constant 0 : index
    %45 = vector.load %arg2[%c32, %c0_13] : memref<232x128xf32, #tpu.memory_space<vmem>>, vector<128x32xf32>
    %cst_14 = arith.constant dense<0.000000e+00> : vector<16x32xf32>
    %46 = tpu.matmul %44, %45, %cst_14 {dimension_numbers = #tpu.dot_dimension_numbers<[1], [0], [0], [1], [0, 0, 1, 1], [], []>} : vector<16x128xf32>, vector<128x32xf32>, vector<16x32xf32> -> vector<16x32xf32>
    %47 = vector.broadcast %2 : vector<1x32xf32> to vector<16x32xf32>
    %48 = arith.addf %46, %47 : vector<16x32xf32>
    %49 = math.absf %48 : vector<16x32xf32>
    %cst_15 = arith.constant 0.000000e+00 : f32
    %50 = vector.broadcast %cst_15 : f32 to vector<16x32xf32>
    %51 = arith.subf %50, %49 : vector<16x32xf32>
    %52 = math.exp %51 : vector<16x32xf32>
    %cst_16 = arith.constant 0.000000e+00 : f32
    %53 = vector.broadcast %cst_16 : f32 to vector<16x32xf32>
    %54 = arith.cmpf oge, %48, %53 : vector<16x32xf32>
    %cst_17 = arith.constant 1.000000e+00 : f32
    %55 = vector.broadcast %cst_17 : f32 to vector<16x32xf32>
    %56 = arith.select %54, %55, %52 : vector<16x32xi1>, vector<16x32xf32>
    %cst_18 = arith.constant 1.000000e+00 : f32
    %57 = vector.broadcast %cst_18 : f32 to vector<16x32xf32>
    %58 = arith.addf %57, %52 : vector<16x32xf32>
    %59 = arith.divf %56, %58 : vector<16x32xf32>
    %60 = arith.mulf %48, %59 : vector<16x32xf32>
    %c160 = arith.constant 160 : index
    %c0_19 = arith.constant 0 : index
    %61 = vector.load %arg2[%c160, %c0_19] : memref<232x128xf32, #tpu.memory_space<vmem>>, vector<32x64xf32>
    %cst_20 = arith.constant dense<0.000000e+00> : vector<16x64xf32>
    %62 = tpu.matmul %60, %61, %cst_20 {dimension_numbers = #tpu.dot_dimension_numbers<[1], [0], [0], [1], [0, 0, 1, 1], [], []>} : vector<16x32xf32>, vector<32x64xf32>, vector<16x64xf32> -> vector<16x64xf32>
    %63 = vector.extract_strided_slice %62 {offsets = [0, 0], sizes = [16, 32], strides = [1, 1]} : vector<16x64xf32> to vector<16x32xf32>
    %64 = vector.broadcast %3 : vector<1x32xf32> to vector<16x32xf32>
    %65 = arith.addf %63, %64 : vector<16x32xf32>
    %cst_21 = arith.constant 0.000000e+00 : f32
    %66 = vector.broadcast %cst_21 : f32 to vector<16x32xf32>
    %67 = arith.maximumf %65, %66 : vector<16x32xf32>
    %68 = math.absf %65 : vector<16x32xf32>
    %cst_22 = arith.constant 0.000000e+00 : f32
    %69 = vector.broadcast %cst_22 : f32 to vector<16x32xf32>
    %70 = arith.subf %69, %68 : vector<16x32xf32>
    %71 = math.exp %70 : vector<16x32xf32>
    %cst_23 = arith.constant 1.000000e+00 : f32
    %72 = vector.broadcast %cst_23 : f32 to vector<16x32xf32>
    %73 = arith.addf %72, %71 : vector<16x32xf32>
    %74 = math.log %73 : vector<16x32xf32>
    %75 = arith.addf %67, %74 : vector<16x32xf32>
    %76 = vector.extract_strided_slice %62 {offsets = [0, 32], sizes = [16, 16], strides = [1, 1]} : vector<16x64xf32> to vector<16x16xf32>
    %77 = vector.extract_strided_slice %62 {offsets = [0, 48], sizes = [16, 16], strides = [1, 1]} : vector<16x64xf32> to vector<16x16xf32>
    %c0_24 = arith.constant 0 : index
    %c0_25 = arith.constant 0 : index
    %78 = vector.load %arg3[%c0_24, %c0_25] : memref<80x512xf32, #tpu.memory_space<vmem>>, vector<32x512xf32>
    %c32_26 = arith.constant 32 : index
    %c0_27 = arith.constant 0 : index
    %79 = vector.load %arg3[%c32_26, %c0_27] : memref<80x512xf32, #tpu.memory_space<vmem>>, vector<32x512xf32>
    %c64 = arith.constant 64 : index
    %c0_28 = arith.constant 0 : index
    %80 = vector.load %arg3[%c64, %c0_28] : memref<80x512xf32, #tpu.memory_space<vmem>>, vector<16x512xf32>
    %cst_29 = arith.constant dense<0.000000e+00> : vector<16x512xf32>
    %81 = tpu.matmul %75, %78, %cst_29 {dimension_numbers = #tpu.dot_dimension_numbers<[1], [0], [0], [1], [0, 0, 1, 1], [], []>} : vector<16x32xf32>, vector<32x512xf32>, vector<16x512xf32> -> vector<16x512xf32>
    %82 = math.exp %81 : vector<16x512xf32>
    %83 = arith.mulf %75, %60 : vector<16x32xf32>
    %cst_30 = arith.constant dense<0.000000e+00> : vector<16x512xf32>
    %84 = tpu.matmul %83, %79, %cst_30 {dimension_numbers = #tpu.dot_dimension_numbers<[1], [0], [0], [1], [0, 0, 1, 1], [], []>} : vector<16x32xf32>, vector<32x512xf32>, vector<16x512xf32> -> vector<16x512xf32>
    %cst_31 = arith.constant dense<0.000000e+00> : vector<16x512xf32>
    %85 = tpu.matmul %76, %80, %cst_31 {dimension_numbers = #tpu.dot_dimension_numbers<[1], [0], [0], [1], [0, 0, 1, 1], [], []>} : vector<16x16xf32>, vector<16x512xf32>, vector<16x512xf32> -> vector<16x512xf32>
    %cst_32 = arith.constant dense<0.000000e+00> : vector<16x512xf32>
    %86 = tpu.matmul %77, %80, %cst_32 {dimension_numbers = #tpu.dot_dimension_numbers<[1], [0], [0], [1], [0, 0, 1, 1], [], []>} : vector<16x16xf32>, vector<16x512xf32>, vector<16x512xf32> -> vector<16x512xf32>
    %87 = arith.mulf %84, %85 : vector<16x512xf32>
    %88 = vector.shape_cast %82 : vector<16x512xf32> to vector<2x8x512xf32>
    %89 = vector.shape_cast %87 : vector<16x512xf32> to vector<2x8x512xf32>
    %90 = vector.shape_cast %86 : vector<16x512xf32> to vector<2x8x512xf32>
    %cst_33 = arith.constant 0.000000e+00 : f32
    %91 = vector.broadcast %cst_33 : f32 to vector<2x512xf32>
    %92 = vector.extract_strided_slice %88 {offsets = [0, 0, 0], sizes = [2, 1, 512], strides = [1, 1, 1]} : vector<2x8x512xf32> to vector<2x1x512xf32>
    %93 = vector.shape_cast %92 : vector<2x1x512xf32> to vector<2x512xf32>
    %94 = arith.mulf %93, %91 : vector<2x512xf32>
    %95 = vector.extract_strided_slice %89 {offsets = [0, 0, 0], sizes = [2, 1, 512], strides = [1, 1, 1]} : vector<2x8x512xf32> to vector<2x1x512xf32>
    %96 = vector.shape_cast %95 : vector<2x1x512xf32> to vector<2x512xf32>
    %97 = arith.addf %94, %96 : vector<2x512xf32>
    %98 = vector.extract_strided_slice %90 {offsets = [0, 0, 0], sizes = [2, 1, 512], strides = [1, 1, 1]} : vector<2x8x512xf32> to vector<2x1x512xf32>
    %99 = vector.shape_cast %98 : vector<2x1x512xf32> to vector<2x512xf32>
    %100 = arith.mulf %97, %99 : vector<2x512xf32>
    %101 = vector.extract_strided_slice %88 {offsets = [0, 1, 0], sizes = [2, 1, 512], strides = [1, 1, 1]} : vector<2x8x512xf32> to vector<2x1x512xf32>
    %102 = vector.shape_cast %101 : vector<2x1x512xf32> to vector<2x512xf32>
    %103 = arith.mulf %102, %97 : vector<2x512xf32>
    %104 = vector.extract_strided_slice %89 {offsets = [0, 1, 0], sizes = [2, 1, 512], strides = [1, 1, 1]} : vector<2x8x512xf32> to vector<2x1x512xf32>
    %105 = vector.shape_cast %104 : vector<2x1x512xf32> to vector<2x512xf32>
    %106 = arith.addf %103, %105 : vector<2x512xf32>
    %107 = vector.extract_strided_slice %90 {offsets = [0, 1, 0], sizes = [2, 1, 512], strides = [1, 1, 1]} : vector<2x8x512xf32> to vector<2x1x512xf32>
    %108 = vector.shape_cast %107 : vector<2x1x512xf32> to vector<2x512xf32>
    %109 = arith.mulf %106, %108 : vector<2x512xf32>
    %110 = vector.extract_strided_slice %88 {offsets = [0, 2, 0], sizes = [2, 1, 512], strides = [1, 1, 1]} : vector<2x8x512xf32> to vector<2x1x512xf32>
    %111 = vector.shape_cast %110 : vector<2x1x512xf32> to vector<2x512xf32>
    %112 = arith.mulf %111, %106 : vector<2x512xf32>
    %113 = vector.extract_strided_slice %89 {offsets = [0, 2, 0], sizes = [2, 1, 512], strides = [1, 1, 1]} : vector<2x8x512xf32> to vector<2x1x512xf32>
    %114 = vector.shape_cast %113 : vector<2x1x512xf32> to vector<2x512xf32>
    %115 = arith.addf %112, %114 : vector<2x512xf32>
    %116 = vector.extract_strided_slice %90 {offsets = [0, 2, 0], sizes = [2, 1, 512], strides = [1, 1, 1]} : vector<2x8x512xf32> to vector<2x1x512xf32>
    %117 = vector.shape_cast %116 : vector<2x1x512xf32> to vector<2x512xf32>
    %118 = arith.mulf %115, %117 : vector<2x512xf32>
    %119 = vector.extract_strided_slice %88 {offsets = [0, 3, 0], sizes = [2, 1, 512], strides = [1, 1, 1]} : vector<2x8x512xf32> to vector<2x1x512xf32>
    %120 = vector.shape_cast %119 : vector<2x1x512xf32> to vector<2x512xf32>
    %121 = arith.mulf %120, %115 : vector<2x512xf32>
    %122 = vector.extract_strided_slice %89 {offsets = [0, 3, 0], sizes = [2, 1, 512], strides = [1, 1, 1]} : vector<2x8x512xf32> to vector<2x1x512xf32>
    %123 = vector.shape_cast %122 : vector<2x1x512xf32> to vector<2x512xf32>
    %124 = arith.addf %121, %123 : vector<2x512xf32>
    %125 = vector.extract_strided_slice %90 {offsets = [0, 3, 0], sizes = [2, 1, 512], strides = [1, 1, 1]} : vector<2x8x512xf32> to vector<2x1x512xf32>
    %126 = vector.shape_cast %125 : vector<2x1x512xf32> to vector<2x512xf32>
    %127 = arith.mulf %124, %126 : vector<2x512xf32>
    %128 = vector.extract_strided_slice %88 {offsets = [0, 4, 0], sizes = [2, 1, 512], strides = [1, 1, 1]} : vector<2x8x512xf32> to vector<2x1x512xf32>
    %129 = vector.shape_cast %128 : vector<2x1x512xf32> to vector<2x512xf32>
    %130 = arith.mulf %129, %124 : vector<2x512xf32>
    %131 = vector.extract_strided_slice %89 {offsets = [0, 4, 0], sizes = [2, 1, 512], strides = [1, 1, 1]} : vector<2x8x512xf32> to vector<2x1x512xf32>
    %132 = vector.shape_cast %131 : vector<2x1x512xf32> to vector<2x512xf32>
    %133 = arith.addf %130, %132 : vector<2x512xf32>
    %134 = vector.extract_strided_slice %90 {offsets = [0, 4, 0], sizes = [2, 1, 512], strides = [1, 1, 1]} : vector<2x8x512xf32> to vector<2x1x512xf32>
    %135 = vector.shape_cast %134 : vector<2x1x512xf32> to vector<2x512xf32>
    %136 = arith.mulf %133, %135 : vector<2x512xf32>
    %137 = vector.extract_strided_slice %88 {offsets = [0, 5, 0], sizes = [2, 1, 512], strides = [1, 1, 1]} : vector<2x8x512xf32> to vector<2x1x512xf32>
    %138 = vector.shape_cast %137 : vector<2x1x512xf32> to vector<2x512xf32>
    %139 = arith.mulf %138, %133 : vector<2x512xf32>
    %140 = vector.extract_strided_slice %89 {offsets = [0, 5, 0], sizes = [2, 1, 512], strides = [1, 1, 1]} : vector<2x8x512xf32> to vector<2x1x512xf32>
    %141 = vector.shape_cast %140 : vector<2x1x512xf32> to vector<2x512xf32>
    %142 = arith.addf %139, %141 : vector<2x512xf32>
    %143 = vector.extract_strided_slice %90 {offsets = [0, 5, 0], sizes = [2, 1, 512], strides = [1, 1, 1]} : vector<2x8x512xf32> to vector<2x1x512xf32>
    %144 = vector.shape_cast %143 : vector<2x1x512xf32> to vector<2x512xf32>
    %145 = arith.mulf %142, %144 : vector<2x512xf32>
    %146 = vector.extract_strided_slice %88 {offsets = [0, 6, 0], sizes = [2, 1, 512], strides = [1, 1, 1]} : vector<2x8x512xf32> to vector<2x1x512xf32>
    %147 = vector.shape_cast %146 : vector<2x1x512xf32> to vector<2x512xf32>
    %148 = arith.mulf %147, %142 : vector<2x512xf32>
    %149 = vector.extract_strided_slice %89 {offsets = [0, 6, 0], sizes = [2, 1, 512], strides = [1, 1, 1]} : vector<2x8x512xf32> to vector<2x1x512xf32>
    %150 = vector.shape_cast %149 : vector<2x1x512xf32> to vector<2x512xf32>
    %151 = arith.addf %148, %150 : vector<2x512xf32>
    %152 = vector.extract_strided_slice %90 {offsets = [0, 6, 0], sizes = [2, 1, 512], strides = [1, 1, 1]} : vector<2x8x512xf32> to vector<2x1x512xf32>
    %153 = vector.shape_cast %152 : vector<2x1x512xf32> to vector<2x512xf32>
    %154 = arith.mulf %151, %153 : vector<2x512xf32>
    %155 = vector.extract_strided_slice %88 {offsets = [0, 7, 0], sizes = [2, 1, 512], strides = [1, 1, 1]} : vector<2x8x512xf32> to vector<2x1x512xf32>
    %156 = vector.shape_cast %155 : vector<2x1x512xf32> to vector<2x512xf32>
    %157 = arith.mulf %156, %151 : vector<2x512xf32>
    %158 = vector.extract_strided_slice %89 {offsets = [0, 7, 0], sizes = [2, 1, 512], strides = [1, 1, 1]} : vector<2x8x512xf32> to vector<2x1x512xf32>
    %159 = vector.shape_cast %158 : vector<2x1x512xf32> to vector<2x512xf32>
    %160 = arith.addf %157, %159 : vector<2x512xf32>
    %161 = vector.extract_strided_slice %90 {offsets = [0, 7, 0], sizes = [2, 1, 512], strides = [1, 1, 1]} : vector<2x8x512xf32> to vector<2x1x512xf32>
    %162 = vector.shape_cast %161 : vector<2x1x512xf32> to vector<2x512xf32>
    %163 = arith.mulf %160, %162 : vector<2x512xf32>
    %164 = vector.shape_cast %100 : vector<2x512xf32> to vector<2x1x512xf32>
    %165 = vector.shape_cast %109 : vector<2x512xf32> to vector<2x1x512xf32>
    %166 = vector.shape_cast %118 : vector<2x512xf32> to vector<2x1x512xf32>
    %167 = vector.shape_cast %127 : vector<2x512xf32> to vector<2x1x512xf32>
    %168 = vector.shape_cast %136 : vector<2x512xf32> to vector<2x1x512xf32>
    %169 = vector.shape_cast %145 : vector<2x512xf32> to vector<2x1x512xf32>
    %170 = vector.shape_cast %154 : vector<2x512xf32> to vector<2x1x512xf32>
    %171 = vector.shape_cast %163 : vector<2x512xf32> to vector<2x1x512xf32>
    %172 = tpu.concatenate %164, %165, %166, %167, %168, %169, %170, %171 in 1 : vector<2x1x512xf32>, vector<2x1x512xf32>, vector<2x1x512xf32>, vector<2x1x512xf32>, vector<2x1x512xf32>, vector<2x1x512xf32>, vector<2x1x512xf32>, vector<2x1x512xf32> -> vector<2x8x512xf32>
    %173 = vector.shape_cast %172 : vector<2x8x512xf32> to vector<16x512xf32>
    %c0_34 = arith.constant 0 : index
    %c0_35 = arith.constant 0 : index
    %174 = vector.load %arg4[%c0_34, %c0_35] : memref<512x32xf32, #tpu.memory_space<vmem>>, vector<512x32xf32>
    %cst_36 = arith.constant dense<0.000000e+00> : vector<16x32xf32>
    %175 = tpu.matmul %173, %174, %cst_36 {dimension_numbers = #tpu.dot_dimension_numbers<[1], [0], [0], [1], [0, 0, 1, 1], [], []>} : vector<16x512xf32>, vector<512x32xf32>, vector<16x32xf32> -> vector<16x32xf32>
    %176 = vector.broadcast %4 : vector<1x32xf32> to vector<16x32xf32>
    %177 = arith.mulf %60, %176 : vector<16x32xf32>
    %178 = arith.addf %175, %177 : vector<16x32xf32>
    %179 = arith.mulf %178, %35 : vector<16x32xf32>
    %c192 = arith.constant 192 : index
    %c0_37 = arith.constant 0 : index
    %180 = vector.load %arg2[%c192, %c0_37] : memref<232x128xf32, #tpu.memory_space<vmem>>, vector<32x32xf32>
    %cst_38 = arith.constant dense<0.000000e+00> : vector<16x32xf32>
    %181 = tpu.matmul %179, %180, %cst_38 {dimension_numbers = #tpu.dot_dimension_numbers<[1], [0], [0], [1], [0, 0, 1, 1], [], []>} : vector<16x32xf32>, vector<32x32xf32>, vector<16x32xf32> -> vector<16x32xf32>
    %182 = vector.broadcast %5 : vector<1x32xf32> to vector<16x32xf32>
    %183 = arith.addf %181, %182 : vector<16x32xf32>
    %184 = arith.addf %183, %7 : vector<16x32xf32>
    %185 = vector.shape_cast %184 : vector<16x32xf32> to vector<2x8x32xf32>
    %c0_39 = arith.constant 0 : index
    %c0_40 = arith.constant 0 : index
    %c0_41 = arith.constant 0 : index
    %186 = vector.load %arg5[%c0_39, %c0_40, %c0_41] : memref<2x8x32xf32, #tpu.memory_space<vmem>>, vector<2x8x32xf32>
    tpu.vector_store %arg5[%c0_39, %c0_40, %c0_41], %185 {strides = array<i32>} : memref<2x8x32xf32, #tpu.memory_space<vmem>>, vector<2x8x32xf32>,
    return
  }
  func.func @transform_0(%arg0: i32) -> (i32, i32, i32) {
    %c0_i32 = arith.constant 0 : i32
    %c0_i32_0 = arith.constant 0 : i32
    %c0_i32_1 = arith.constant 0 : i32
    return %arg0, %c0_i32, %c0_i32_0 : i32, i32, i32
  }
  func.func @transform_1(%arg0: i32) -> (i32, i32) {
    %c0_i32 = arith.constant 0 : i32
    %c0_i32_0 = arith.constant 0 : i32
    %c0_i32_1 = arith.constant 0 : i32
    return %c0_i32, %c0_i32_0 : i32, i32
  }
  func.func @transform_2(%arg0: i32) -> (i32, i32) {
    %c0_i32 = arith.constant 0 : i32
    %c0_i32_0 = arith.constant 0 : i32
    %c0_i32_1 = arith.constant 0 : i32
    return %c0_i32, %c0_i32_0 : i32, i32
  }
  func.func @transform_3(%arg0: i32) -> (i32, i32) {
    %c0_i32 = arith.constant 0 : i32
    %c0_i32_0 = arith.constant 0 : i32
    %c0_i32_1 = arith.constant 0 : i32
    return %c0_i32, %c0_i32_0 : i32, i32
  }
  func.func @transform_4(%arg0: i32) -> (i32, i32, i32) {
    %c0_i32 = arith.constant 0 : i32
    %c0_i32_0 = arith.constant 0 : i32
    %c0_i32_1 = arith.constant 0 : i32
    return %arg0, %c0_i32, %c0_i32_0 : i32, i32, i32
  }
}

</mosaic_0001>

<bundles_post_ra>
// kernel: tpu_custom_call.1
= control target key start
LH: loop header
LB: loop body
LE: loop exit
PB: predicated region body
PF: predicated region fallthrough
CT: control target
= control target key end

     0   :  { %vm23_vm0 = vcmask 261120   ;;  %s3243_s0 = inlined_call_operand.vmem [shape: f32[2,8,32], index: 0, kind: input, shape index: {}]   ;;  %s3244_s1 = inlined_call_operand.vmem [shape: f32[232,128], index: 1, kind: input, shape index: {}]   ;;  %s3245_s2 = inlined_call_operand.vmem [shape: f32[80,512], index: 2, kind: input, shape index: {}]   ;;  %s3246_s3 = inlined_call_operand.vmem [shape: f32[512,32], index: 3, kind: input, shape index: {}]   ;;  %s3247_s4 = inlined_call_operand.hbm [shape: f32[2,8,32], index: 4, kind: output, shape index: {}]  }
   0x1   :  { %v19_v0 = vld [vmem:[%s3243_s0] sm:$0xff]  ;;  %v20_v1 = vld [vmem:[%s3243_s0 + $0x8] sm:$0xff] }
   0x2   :  { %9 = vsyncpa [#allocation3], 0  ;;  %v21_v2 = vmul.f32 %v19_v0, %v19_v0  ;;  %v22_v3 = vmul.f32 %v20_v1, %v20_v1  ;;  %v39_v6 = vld [vmem:[%s3244_s1] sm:$0xff]  ;;  %v40_v7 = vld [vmem:[%s3244_s1 + $0x8] sm:$0xff]  ;;  %v124_v40 = vlaneseq  ;;  %vm156_vm1 = vcmask 1042432   ;;  %s2367_s9 = smov 96  }
   0x3   :  { %v41_v8 = vld [vmem:[%s3244_s1 + $0x10] sm:$0xff]  ;;  %v2105_v9 = vpack.c.bf16 %v40_v7, %v39_v6  ;;  %v42_v10 = vld [vmem:[%s3244_s1 + $0x18] sm:$0xff]  ;;  %v208_v22 = vld [vmem:[%s3244_s1 + $0x20] sm:$0xff]  ;;  %vm187_vm2 = vcmask 1044480   ;;  %vm161_vm3 = vcmask 1046528   ;;  %vm174_vm4 = vcmask 1045504  }
   0x4   :  { %v24_v4 = vsel %vm23_vm0, %v21_v2, 0.0  ;;  %v27_v5 = vsel %vm23_vm0, %v22_v3, 0.0  ;;  %v2109_v11 = vpack.c.bf16 %v42_v10, %v41_v8  ;;  %v209_v23 = vld [vmem:[%s3244_s1 + $0x28] sm:$0xff]  ;;  %v210_v24 = vld [vmem:[%s3244_s1 + $0x30] sm:$0xff]  ;;  %v211_v26 = vld [vmem:[%s3244_s1 + $0x38] sm:$0xff]  ;;  %v2458_v41 = vshrl.u32 %v124_v40, 7 }
   0x5   :  { %25 = vadd.xlane.f32.xlu0 %v24_v4  ;;  %2106 = vmatprep.subr.bf16.mxu0 %v2105_v9  ;;  %v2113_v25 = vpack.c.bf16 %v209_v23, %v208_v22  ;;  %v2117_v27 = vpack.c.bf16 %v211_v26, %v210_v24  ;;  %v212_v28 = vld [vmem:[%s3244_s1 + $0x40] sm:$0xff]  ;;  %v213_v29 = vld [vmem:[%s3244_s1 + $0x48] sm:$0xff]  ;;  %v214_v31 = vld [vmem:[%s3244_s1 + $0x50] sm:$0xff]  ;;  %s2368_s10 = smov 32   ;;  %s2369_s11 = smov 64   ;;  %vm202_vm5 = vcmask 523264  }
   0x6   :  { %2108 = vmatpush3.bf16.msra.mxu0 %v2105_v9  ;;  %v2121_v30 = vpack.c.bf16 %v213_v29, %v212_v28  ;;  %v215_v32 = vld [vmem:[%s3244_s1 + $0x58] sm:$0xff]  ;;  %v216_v34 = vld [vmem:[%s3244_s1 + $0x60] sm:$0xff]  ;;  %v217_v35 = vld [vmem:[%s3244_s1 + $0x68] sm:$0xff]  ;;  %v126_v42 = vsub.s32 0, %v2458_v41  ;;  %vm205_vm6 = vcmask 785408   ;;  %vm816_vm11 = vcmask 130048  }
   0x7   :  { %2110 = vmatprep.subr.bf16.mxu0 %v2109_v11  ;;  %2114 = vmatprep.subr.bf16.mxu1 %v2113_v25  ;;  %v2125_v33 = vpack.c.bf16 %v215_v32, %v214_v31  ;;  %v2129_v36 = vpack.c.bf16 %v217_v35, %v216_v34  ;;  %v218_v37 = vld [vmem:[%s3244_s1 + $0x70] sm:$0xff]  ;;  %v219_v38 = vld [vmem:[%s3244_s1 + $0x78] sm:$0xff]  ;;  %v2464_v43 = vld [vmem:[%s3244_s1 + $0xe0] sm:$0xff]  ;;  %vm1505_vm12 = vcmask 1040384   ;;  %vm1514_vm13 = vcmask 1041408  }
   0x8   :  { %2116 = vmatpush3.bf16.msra.mxu1 %v2113_v25  ;;  %v2133_v39 = vpack.c.bf16 %v219_v38, %v218_v37  ;;  %v127_v44 = vrot.slane %v2464_v43, %v126_v42  ;;  %v220_v46 = vld [vmem:[%s3244_s1 + $0x80] sm:$0xff]  ;;  %v221_v47 = vld [vmem:[%s3244_s1 + $0x88] sm:$0xff]  ;;  %v222_v63 = vld [vmem:[%s3244_s1 + $0x90] sm:$0xff]  ;;  %v226_v37 = vsub.s32 1, %v2458_v41  ;;  %vm1531_vm14 = vcmask 1043456  }
   0x9   :  { %28 = vadd.xlane.f32.xlu0 %v27_v5  ;;  %2118 = vmatprep.subr.bf16.mxu1 %v2117_v27  ;;  %v2137_v50 = vpack.c.bf16 %v221_v47, %v220_v46  ;;  %v323_v31 = vld [vmem:[%s3244_s1 + $0xa0] sm:$0xff]  ;;  %v324_v32 = vld [vmem:[%s3244_s1 + $0xa8] sm:$0xff]  ;;  %v325_v34 = vld [vmem:[%s3244_s1 + $0xb0] sm:$0xff] }
   0xa   :  { %2112 = vmatpush3.bf16.msra.mxu0 %v2109_v11  ;;  %v326_v35 = vld [vmem:[%s3244_s1 + $0xb8] sm:$0xff]  ;;  %v227_v38 = vrot.slane %v2464_v43, %v226_v37 }
   0xc   :  { %2120 = vmatpush3.bf16.msra.mxu1 %v2117_v27 }
   0xd   :  { %2122 = vmatprep.subr.bf16.mxu1 %v2121_v30 }
  0x10   :  { %2124 = vmatpush3.bf16.msra.mxu1 %v2121_v30 }
  0x11   :  { %2126 = vmatprep.subr.bf16.mxu1 %v2125_v33 }
  0x14   :  { %2128 = vmatpush3.bf16.msra.mxu1 %v2125_v33  ;;  %v2145_v33 = vpack.c.bf16 %v324_v32, %v323_v31 }
  0x15   :  { %2130 = vmatprep.subr.bf16.mxu1 %v2129_v36 }
  0x16   :  { %2146 = vmatprep.subr.bf16.mxu0 %v2145_v33 }
  0x18   :  { %2132 = vmatpush3.bf16.msra.mxu1 %v2129_v36  ;;  %v2149_v36 = vpack.c.bf16 %v326_v35, %v325_v34 }
  0x19   :  { %2134 = vmatprep.subr.bf16.mxu1 %v2133_v39 }
  0x1c   :  { %2136 = vmatpush3.bf16.msra.mxu1 %v2133_v39 }
  0x1d   :  { %2138 = vmatprep.subr.bf16.mxu1 %v2137_v50 }
  0x20   :  { %2140 = vmatpush3.bf16.msra.mxu1 %v2137_v50 }
  0x92   :  { %v26_v12 = vpop.xlane.xlu0 %25 }
  0x93   :  { %v31_v13 = vmul.f32 0.03125, %v26_v12 }
  0x95   :  { %v33_v14 = vadd.f32 1e-06, %v31_v13 }
  0x96   :  { %v29_v15 = vpop.xlane.xlu0 %28 }
  0x97   :  { %2296 = vrsqrt.f32 %v33_v14  ;;  %v32_v16 = vmul.f32 0.03125, %v29_v15 }
  0x99   :  { %v34_v17 = vadd.f32 1e-06, %v32_v16 }
  0x9b   :  { %2298 = vrsqrt.f32 %v34_v17 }
  0xa1   :  { %v2297_v18 = vpop.eup %2296 }
  0xa2   :  { %v37_v19 = vmul.f32 %v2297_v18, %v19_v0  ;;  %v223_v0 = vld [vmem:[%s3244_s1 + $0x98] sm:$0xff] }
  0xa3   :  { %v2141_v11 = vpack.c.bf16 %v223_v0, %v222_v63 }
  0xa4   :  { %2045 = vmatprep.mubr.msk.f32.mxu0 %vm23_vm0, %v37_v19 }
  0xa5   :  { %v2299_v20 = vpop.eup %2298  ;;  %2142 = vmatprep.subr.bf16.mxu1 %v2141_v11 }
  0xa6   :  { %v38_v21 = vmul.f32 %v2299_v20, %v20_v1  ;;  %2144 = vmatpush3.bf16.msra.mxu1 %v2141_v11  ;;  %v454_v11 = vld [vmem:[%s3245_s2 + $0xb0] sm:$0xff] }
  0xa8   :  { %2046 = vmatmul.mubr.msk.f32.vlgmr.msra.gmra.mrb[0].mxu0 %vm23_vm0, %v38_v21 }
  0xa9   :  { %2148 = vmatpush3.bf16.msra.mxu0 %v2145_v33 }
  0xaa   :  { %2150 = vmatprep.subr.bf16.mxu0 %v2149_v36 }
  0xad   :  { %2152 = vmatpush3.bf16.msra.mxu0 %v2149_v36 }
 0x17b   :  { %v2467_v45 = vpop.f32.mrb[0].mxu0 }
 0x17c   :  { %v129_v48 = vadd.f32 %v2467_v45, %v127_v44  ;;  %v2476_v49 = vpop.f32.mrb[1].mxu0  ;;  %v131_v33 = vand.u32 2147483647, %v2467_v45  ;;  %vm139_vm10 = vcmp.ge.f32.partialorder %v2467_v45, 0.0 }
 0x17d   :  { %v128_v51 = vadd.f32 %v127_v44, %v2476_v49  ;;  %v130_v32 = vand.u32 2147483647, %v2476_v49  ;;  %vm138_vm9 = vcmp.ge.f32.partialorder %v2476_v49, 0.0 }
 0x17e   :  { %v153_v52 = vrot.slane %v129_v48, 5  ;;  %v133_v35 = vsub.f32 0.0, %v131_v33  ;;  %v457_v33 = vld [vmem:[%s3245_s2 + $0xc8] sm:$0xff] }
 0x17f   :  { %v152_v53 = vrot.slane %v128_v51, 5  ;;  %v132_v34 = vsub.f32 0.0, %v130_v32  ;;  %v452_v32 = vld [vmem:[%s3245_s2 + $0xa0] sm:$0xff] }
 0x180   :  { %v158_v54 = vsel %vm156_vm1, 0.0, %v153_v52  ;;  %v192_v55 = vrot.slane %v153_v52, 3  ;;  %v166_v59 = vrot.slane %v153_v52, 1  ;;  %v179_v10 = vrot.slane %v153_v52, 2 }
 0x181   :  { %v157_v56 = vsel %vm156_vm1, 0.0, %v152_v53  ;;  %v189_v57 = vrot.slane %v152_v53, 3  ;;  %v191_v58 = vrot.slane %v158_v54, 3  ;;  %v163_v62 = vrot.slane %v152_v53, 1 }
 0x182   :  { %v188_v60 = vrot.slane %v157_v56, 3  ;;  %v162_v61 = vrot.slane %v157_v56, 1  ;;  %v165_v2 = vrot.slane %v158_v54, 1  ;;  %v175_v3 = vrot.slane %v157_v56, 2 }
 0x183   :  { %v193_v1 = vsel %vm187_vm2, %v191_v58, %v192_v55  ;;  %v176_v6 = vrot.slane %v152_v53, 2  ;;  %v178_v7 = vrot.slane %v158_v54, 2  ;;  %v134_v36 = vmul.f32 1.442695, %v132_v34  ;;  %v461_v34 = vld [vmem:[%s3245_s2 + $0xe8] sm:$0xff] }
 0x184   :  { %v190_v4 = vsel %vm187_vm2, %v188_v60, %v189_v57  ;;  %v164_v5 = vsel %vm161_vm3, %v162_v61, %v163_v62  ;;  %v167_v9 = vsel %vm161_vm3, %v165_v2, %v166_v59  ;;  %v437_v2 = vld [vmem:[%s3245_s2 + $0x28] sm:$0xff]  ;;  %v136_v37 = vmul.f32 1.442695, %v133_v35 }
 0x185   :  { %v2291_v8 = vpack.i.bf16 %v193_v1, %v190_v4  ;;  %v2281_v12 = vpack.i.bf16 %v167_v9, %v164_v5  ;;  %v177_v13 = vsel %vm174_vm4, %v175_v3, %v176_v6  ;;  %v180_v14 = vsel %vm174_vm4, %v178_v7, %v179_v10  ;;  %v433_v1 = vld [vmem:[%s3245_s2 + $0x8] sm:$0xff]  ;;  %v432_v4 = vld [vmem:[%s3245_s2] sm:$0xff]  ;;  %v451_v7 = vld [vmem:[%s3245_s2 + $0x98] sm:$0xff] }
 0x186   :  { %v2286_v15 = vpack.i.bf16 %v180_v14, %v177_v13  ;;  %v2153_v3 = vpack.c.bf16 %v437_v2, %v433_v1  ;;  %v436_v5 = vld [vmem:[%s3245_s2 + $0x20] sm:$0xff]  ;;  %v450_v10 = vld [vmem:[%s3245_s2 + $0x90] sm:$0xff]  ;;  %v441_v13 = vld [vmem:[%s3245_s2 + $0x48] sm:$0xff] }
 0x187   :  { %2292 = vrot.lane.b32.xlu0 %v2291_v8, %s2367_s9  ;;  %2282 = vrot.lane.b32.xlu1 %v2281_v12, %s2368_s10  ;;  %v2155_v6 = vpack.c.bf16 %v436_v5, %v432_v4  ;;  %v455_v8 = vld [vmem:[%s3245_s2 + $0xb8] sm:$0xff]  ;;  %v2179_v12 = vpack.c.bf16 %v454_v11, %v450_v10  ;;  %v445_v14 = vld [vmem:[%s3245_s2 + $0x68] sm:$0xff]  ;;  %s2371_s10 = smov 80  }
 0x188   :  { %2154 = vmatprep.subr.bf16.mxu0 %v2153_v3  ;;  %v2177_v9 = vpack.c.bf16 %v455_v8, %v451_v7  ;;  %v434_v8 = vld [vmem:[%s3245_s2 + $0x10] sm:$0xff]  ;;  %v443_v10 = vld [vmem:[%s3245_s2 + $0x58] sm:$0xff] }
 0x189   :  { %v466_v11 = vld [vmem:[%s3245_s2 + $0x110] sm:$0xff] }
 0x18a   :  { %2178 = vmatprep.subr.bf16.mxu1 %v2177_v9 }
 0x18b   :  { %2287 = vrot.lane.b32.xlu1 %v2286_v15, %s2369_s11  ;;  %v2157_v15 = vpack.c.bf16 %v445_v14, %v441_v13 }
 0x1f9   :  { %v2283_v16 = vpop.permute.xlu1 %2282  ;;  %v2293_v19 = vpop.permute.xlu0 %2292 }
 0x1fa   :  { %v2285_v17 = vunpack.i.h.bf16 %v2283_v16  ;;  %v2284_v18 = vunpack.i.l.bf16 %v2283_v16  ;;  %v2295_v23 = vunpack.i.h.bf16 %v2293_v19  ;;  %v2294_v24 = vunpack.i.l.bf16 %v2293_v19  ;;  %v440_v16 = vld [vmem:[%s3245_s2 + $0x40] sm:$0xff] }
 0x1fc   :  { %v200_v25 = vsel %vm23_vm0, %v157_v56, %v2284_v18  ;;  %v201_v26 = vsel %vm23_vm0, %v158_v54, %v2285_v17  ;;  %v444_v17 = vld [vmem:[%s3245_s2 + $0x60] sm:$0xff]  ;;  %v459_v18 = vld [vmem:[%s3245_s2 + $0xd8] sm:$0xff] }
 0x1fd   :  { %v2288_v20 = vpop.permute.xlu1 %2287  ;;  %v2159_v19 = vpack.c.bf16 %v444_v17, %v440_v16 }
 0x1fe   :  { %v2290_v21 = vunpack.i.h.bf16 %v2288_v20  ;;  %v2289_v22 = vunpack.i.l.bf16 %v2288_v20  ;;  %v463_v20 = vld [vmem:[%s3245_s2 + $0xf8] sm:$0xff] }
 0x200   :  { %v203_v27 = vsel %vm202_vm5, %v200_v25, %v2289_v22  ;;  %v204_v28 = vsel %vm202_vm5, %v201_v26, %v2290_v21  ;;  %v2370_v21 = vmov 0.0   ;;  %v458_v22 = vld [vmem:[%s3245_s2 + $0xd0] sm:$0xff]  ;;  %v435_v26 = vld [vmem:[%s3245_s2 + $0x18] sm:$0xff] }
 0x201   :  { %v206_v29 = vsel %vm205_vm6, %v203_v27, %v2294_v24  ;;  %v207_v30 = vsel %vm205_vm6, %v204_v28, %v2295_v23  ;;  %v462_v23 = vld [vmem:[%s3245_s2 + $0xf0] sm:$0xff]  ;;  %v2181_v24 = vpack.c.bf16 %v463_v20, %v459_v18  ;;  %v439_v27 = vld [vmem:[%s3245_s2 + $0x38] sm:$0xff] }
 0x202   :  { %2080 = vmatprep.mubr.f32.mxu1 %v206_v29  ;;  %v2183_v25 = vpack.c.bf16 %v462_v23, %v458_v22  ;;  %v2161_v28 = vpack.c.bf16 %v439_v27, %v435_v26  ;;  %v467_v29 = vld [vmem:[%s3245_s2 + $0x118] sm:$0xff]  ;;  %v442_v20 = vld [vmem:[%s3245_s2 + $0x50] sm:$0xff]  ;;  %v449_v23 = vld [vmem:[%s3245_s2 + $0x88] sm:$0xff] }
 0x203   :  { %2081 = vmatmul.mubr.f32.vlgmr.msra.gmra.mrb[0].mxu1 %v207_v30  ;;  %v471_v30 = vld [vmem:[%s3245_s2 + $0x138] sm:$0xff]  ;;  %v446_v22 = vld [vmem:[%s3245_s2 + $0x70] sm:$0xff] }
 0x204   :  { %2180 = vmatpush1.bf16.msra.mxu1 %v2179_v12  ;;  %797 = vmatprep.mubr.f32.mxu1 %v2370_v21  ;;  %v2580_v31 = vpack.c.bf16 %v471_v30, %v467_v29  ;;  %v448_v30 = vld [vmem:[%s3245_s2 + $0x80] sm:$0xff] }
 0x205   :  { %2182 = vmatprep.subr.bf16.mxu1 %v2181_v24  ;;  %v453_v24 = vld [vmem:[%s3245_s2 + $0xa8] sm:$0xff] }
 0x206   :  { %v2169_v29 = vpack.c.bf16 %v453_v24, %v449_v23  ;;  %v1586_v24 = vld [vmem:[%s3246_s3 + $0xb0] sm:$0xff] }
 0x208   :  { %2184 = vmatpush1.bf16.msra.mxu1 %v2183_v25 }
 0x209   :  { %2190 = vmatprep.subr.bf16.mxu1 %v2580_v31 }
 0x2d6   :  { %v2082_v39 = vpop.f32.mrb[0].mxu1 }
 0x2d7   :  { %v300_v40 = vadd.f32 %v2082_v39, %v227_v38  ;;  %v294_v42 = vpop.f32.mrb[1].mxu1  ;;  %v410_v39 = vsub.s32 2, %v2458_v41 }
 0x2d8   :  { %v295_v44 = vadd.f32 %v294_v42, %v227_v38 }
 0x2d9   :  { %v304_v46 = vand.u32 2147483647, %v300_v40  ;;  %vm312_vm7 = vcmp.ge.f32.partialorder %v300_v40, 0.0 }
 0x2da   :  { %v303_v47 = vand.u32 2147483647, %v295_v44  ;;  %vm311_vm8 = vcmp.ge.f32.partialorder %v295_v44, 0.0 }
 0x2db   :  { %v306_v48 = vsub.f32 0.0, %v304_v46 }
 0x2dc   :  { %v305_v50 = vsub.f32 0.0, %v303_v47 }
 0x2dd   :  { %v309_v51 = vmul.f32 1.442695, %v306_v48 }
 0x2de   :  { %v307_v52 = vmul.f32 1.442695, %v305_v50 }
 0x2df   :  { %2300 = vpow2.f32 %v309_v51 }
 0x2e0   :  { %2302 = vpow2.f32 %v307_v52 }
 0x2e9   :  { %v2301_v53 = vpop.eup %2300 }
 0x2ea   :  { %v2303_v54 = vpop.eup %2302  ;;  %v316_v55 = vadd.f32 1.0, %v2301_v53  ;;  %v314_v58 = vsel %vm312_vm7, 1.0, %v2301_v53 }
 0x2eb   :  { %v315_v56 = vadd.f32 1.0, %v2303_v54  ;;  %v313_v61 = vsel %vm311_vm8, 1.0, %v2303_v54 }
 0x2ec   :  { %2304 = vrcp.f32 %v316_v55 }
 0x2ed   :  { %2306 = vrcp.f32 %v315_v56 }
 0x2ee   :  { %2308 = vpow2.f32 %v134_v36  ;;  %v2171_v36 = vpack.c.bf16 %v452_v32, %v448_v30  ;;  %v1570_v30 = vld [vmem:[%s3246_s3 + $0x30] sm:$0xff]  ;;  %v1571_v32 = vld [vmem:[%s3246_s3 + $0x38] sm:$0xff] }
 0x2ef   :  { %2310 = vpow2.f32 %v136_v37  ;;  %v2173_v37 = vpack.c.bf16 %v461_v34, %v457_v33  ;;  %v1602_v34 = vld [vmem:[%s3246_s3 + $0x130] sm:$0xff] }
 0x2f6   :  { %v2305_v57 = vpop.eup %2304 }
 0x2f7   :  { %v2307_v59 = vpop.eup %2306  ;;  %v320_v60 = vmul.f32 %v2305_v57, %v314_v58 }
 0x2f8   :  { %v318_v62 = vmul.f32 %v2307_v59, %v313_v61  ;;  %v2309_v38 = vpop.eup %2308 }
 0x2f9   :  { %v2512_v0 = vmul.f32 %v320_v60, %v300_v40  ;;  %v142_v40 = vadd.f32 1.0, %v2309_v38  ;;  %v2311_v42 = vpop.eup %2310 }
 0x2fa   :  { %v2510_v63 = vmul.f32 %v318_v62, %v295_v44  ;;  %v411_v44 = vrot.slane %v2464_v43, %v410_v39  ;;  %v143_v46 = vadd.f32 1.0, %v2311_v42  ;;  %v140_v43 = vsel %vm138_vm9, 1.0, %v2309_v38  ;;  %v456_v38 = vld [vmem:[%s3245_s2 + $0xc0] sm:$0xff] }
 0x2fb   :  { %2312 = vrcp.f32 %v142_v40  ;;  %v141_v61 = vsel %vm139_vm10, 1.0, %v2311_v42  ;;  %v460_v39 = vld [vmem:[%s3245_s2 + $0xe0] sm:$0xff]  ;;  %v469_v40 = vld [vmem:[%s3245_s2 + $0x128] sm:$0xff] }
 0x2fc   :  { %2091 = vmatprep.mubr.msk.f32.mxu0 %vm23_vm0, %v2510_v63  ;;  %2314 = vrcp.f32 %v143_v46  ;;  %v2175_v42 = vpack.c.bf16 %v460_v39, %v456_v38  ;;  %v464_v46 = vld [vmem:[%s3245_s2 + $0x100] sm:$0xff]  ;;  %v1621_v39 = vld [vmem:[%s3246_s3 + $0x1c8] sm:$0xff] }
 0x2fd   :  { %2092 = vmatmul.mubr.msk.f32.vlgmr.msra.gmra.mrb[2].mxu0 %vm23_vm0, %v2512_v0  ;;  %v1620_v38 = vld [vmem:[%s3246_s3 + $0x1c0] sm:$0xff] }
 0x2fe   :  { %2156 = vmatpush1.bf16.msra.mxu0 %v2155_v6  ;;  %542 = vmatprep.mubr.f32.mxu0 %v2370_v21 }
 0x2ff   :  { %2158 = vmatprep.subr.bf16.mxu0 %v2157_v15  ;;  %v470_v15 = vld [vmem:[%s3245_s2 + $0x130] sm:$0xff] }
 0x300   :  { %v2191_v25 = vpack.c.bf16 %v470_v15, %v466_v11  ;;  %v1584_v11 = vld [vmem:[%s3246_s3 + $0xa0] sm:$0xff] }
 0x301   :  { %v1616_v15 = vld [vmem:[%s3246_s3 + $0x1a0] sm:$0xff] }
 0x302   :  { %2160 = vmatpush1.bf16.msra.mxu0 %v2159_v19 }
 0x303   :  { %2162 = vmatprep.subr.bf16.mxu0 %v2161_v28  ;;  %v2167_v28 = vpack.c.bf16 %v446_v22, %v442_v20  ;;  %v1600_v20 = vld [vmem:[%s3246_s3 + $0x120] sm:$0xff]  ;;  %v1601_v22 = vld [vmem:[%s3246_s3 + $0x128] sm:$0xff] }
 0x305   :  { %v2313_v58 = vpop.eup %2312 }
 0x306   :  { %v145_v59 = vmul.f32 %v2313_v58, %v140_v43  ;;  %v2315_v60 = vpop.eup %2314  ;;  %v1564_v58 = vld [vmem:[%s3246_s3] sm:$0xff]  ;;  %v1565_v43 = vld [vmem:[%s3246_s3 + $0x8] sm:$0xff] }
 0x307   :  { %v147_v1 = vmul.f32 %v2315_v60, %v141_v61  ;;  %v2203_v60 = vpack.c.bf16 %v1565_v43, %v1564_v58  ;;  %v1596_v61 = vld [vmem:[%s3246_s3 + $0x100] sm:$0xff]  ;;  %v1575_v58 = vld [vmem:[%s3246_s3 + $0x58] sm:$0xff]  ;;  %v1606_v43 = vld [vmem:[%s3246_s3 + $0x150] sm:$0xff] }
 0x308   :  { %v148_v62 = vmul.f32 %v145_v59, %v2476_v49  ;;  %v438_v49 = vld [vmem:[%s3245_s2 + $0x30] sm:$0xff] }
 0x309   :  { %v149_v5 = vmul.f32 %v2467_v45, %v147_v1  ;;  %v447_v45 = vld [vmem:[%s3245_s2 + $0x78] sm:$0xff]  ;;  %v2163_v16 = vpack.c.bf16 %v438_v49, %v434_v8  ;;  %v1582_v1 = vld [vmem:[%s3246_s3 + $0x90] sm:$0xff] }
 0x30a   :  { %v2165_v19 = vpack.c.bf16 %v447_v45, %v443_v10  ;;  %v1566_v8 = vld [vmem:[%s3246_s3 + $0x10] sm:$0xff]  ;;  %v1567_v49 = vld [vmem:[%s3246_s3 + $0x18] sm:$0xff] }
 0x30b   :  { %v2207_v10 = vpack.c.bf16 %v1567_v49, %v1566_v8  ;;  %v1599_v45 = vld [vmem:[%s3246_s3 + $0x118] sm:$0xff]  ;;  %v1608_v8 = vld [vmem:[%s3246_s3 + $0x160] sm:$0xff] }
 0x3d0   :  { %v2093_v47 = vpop.f32.mrb[2].mxu0 }
 0x3d1   :  { %v413_v48 = vadd.f32 %v2093_v47, %v411_v44  ;;  %v399_v50 = vpop.f32.mrb[3].mxu0 }
 0x3d2   :  { %v412_v51 = vadd.f32 %v411_v44, %v399_v50  ;;  %812 = vrot.lane.b32.xlu1 %v399_v50, %s2367_s9 }
 0x3d3   :  { %v417_v52 = vand.u32 2147483647, %v413_v48  ;;  %v415_v17 = vmax.f32 %v413_v48, 0.0 }
 0x3d4   :  { %v416_v53 = vand.u32 2147483647, %v412_v51  ;;  %v414_v12 = vmax.f32 %v412_v51, 0.0 }
 0x3d5   :  { %v419_v54 = vsub.f32 0.0, %v417_v52 }
 0x3d6   :  { %v418_v55 = vsub.f32 0.0, %v416_v53  ;;  %814 = vrot.lane.b32.xlu1 %v2093_v47, %s2367_s9 }
 0x3d7   :  { %v422_v56 = vmul.f32 1.442695, %v419_v54  ;;  %v1580_v54 = vld [vmem:[%s3246_s3 + $0x80] sm:$0xff] }
 0x3d8   :  { %v420_v57 = vmul.f32 1.442695, %v418_v55  ;;  %v1581_v55 = vld [vmem:[%s3246_s3 + $0x88] sm:$0xff] }
 0x3d9   :  { %2316 = vpow2.f32 %v422_v56  ;;  %v1612_v56 = vld [vmem:[%s3246_s3 + $0x180] sm:$0xff] }
 0x3da   :  { %2318 = vpow2.f32 %v420_v57  ;;  %975 = vrot.lane.b32.xlu1 %v399_v50, %s2371_s10  ;;  %v2201_v57 = vpack.c.bf16 %v1581_v55, %v1580_v54  ;;  %v1623_v54 = vld [vmem:[%s3246_s3 + $0x1d8] sm:$0xff] }
 0x3de   :  { %977 = vrot.lane.b32.xlu1 %v2093_v47, %s2371_s10  ;;  %v468_v47 = vld [vmem:[%s3245_s2 + $0x120] sm:$0xff] }
 0x3df   :  { %v2187_v48 = vpack.c.bf16 %v468_v47, %v464_v46  ;;  %v1573_v46 = vld [vmem:[%s3246_s3 + $0x48] sm:$0xff]  ;;  %v1604_v47 = vld [vmem:[%s3246_s3 + $0x140] sm:$0xff] }
 0x3e2   :  { %1786 = vrot.lane.b32.xlu1 %v148_v62, %s2367_s9  ;;  %v1597_v62 = vld [vmem:[%s3246_s3 + $0x108] sm:$0xff] }
 0x3e3   :  { %v2317_v2 = vpop.eup %2316 }
 0x3e4   :  { %v2319_v3 = vpop.eup %2318  ;;  %v425_v4 = vadd.f32 1.0, %v2317_v2  ;;  %v2235_v2 = vpack.c.bf16 %v1597_v62, %v1596_v61  ;;  %v1592_v61 = vld [vmem:[%s3246_s3 + $0xe0] sm:$0xff]  ;;  %v1593_v62 = vld [vmem:[%s3246_s3 + $0xe8] sm:$0xff] }
 0x3e5   :  { %v424_v6 = vadd.f32 1.0, %v2319_v3  ;;  %v1583_v3 = vld [vmem:[%s3246_s3 + $0x98] sm:$0xff] }
 0x3e6   :  { %2320 = vlog2.f32 %v425_v4  ;;  %1788 = vrot.lane.b32.xlu1 %v149_v5, %s2367_s9  ;;  %v1614_v4 = vld [vmem:[%s3246_s3 + $0x190] sm:$0xff]  ;;  %v1615_v5 = vld [vmem:[%s3246_s3 + $0x198] sm:$0xff] }
 0x3e7   :  { %2322 = vlog2.f32 %v424_v6  ;;  %v2205_v6 = vpack.c.bf16 %v1583_v3, %v1582_v1  ;;  %v1624_v1 = vld [vmem:[%s3246_s3 + $0x1e0] sm:$0xff] }
 0x3f0   :  { %v2321_v7 = vpop.eup %2320 }
 0x3f1   :  { %v2323_v9 = vpop.eup %2322  ;;  %v429_v14 = vmul.f32 0.6931472, %v2321_v7  ;;  %v2237_v7 = vpack.c.bf16 %v1615_v5, %v1614_v4  ;;  %v2225_v5 = vpack.c.bf16 %v1593_v62, %v1592_v61 }
 0x3f2   :  { %v427_v13 = vmul.f32 0.6931472, %v2323_v9  ;;  %v1598_v9 = vld [vmem:[%s3246_s3 + $0x110] sm:$0xff] }
 0x3f3   :  { %v431_v27 = vadd.f32 %v429_v14, %v415_v17  ;;  %v1568_v17 = vld [vmem:[%s3246_s3 + $0x20] sm:$0xff] }
 0x3f4   :  { %v430_v18 = vadd.f32 %v427_v13, %v414_v12  ;;  %v1585_v12 = vld [vmem:[%s3246_s3 + $0xa8] sm:$0xff]  ;;  %v2239_v13 = vpack.c.bf16 %v1599_v45, %v1598_v9  ;;  %v1595_v45 = vld [vmem:[%s3246_s3 + $0xf8] sm:$0xff] }
 0x3f5   :  { %v649_v35 = vmul.f32 %v431_v27, %v2512_v0  ;;  %v2209_v14 = vpack.c.bf16 %v1585_v12, %v1584_v11  ;;  %v1609_v9 = vld [vmem:[%s3246_s3 + $0x168] sm:$0xff]  ;;  %v1626_v11 = vld [vmem:[%s3246_s3 + $0x1f0] sm:$0xff]  ;;  %v1627_v12 = vld [vmem:[%s3246_s3 + $0x1f8] sm:$0xff] }
 0x3f6   :  { %1907 = vmatmul.mubr.msk.f32.vlgmr.msra.gmra.mrb[4].mxu0 %vm23_vm0, %v430_v18  ;;  %v648_v26 = vmul.f32 %v430_v18, %v2510_v63 }
 0x3f7   :  { %2164 = vmatpush1.bf16.msra.mxu0 %v2163_v16  ;;  %548 = vmatprep.mubr.f32.mxu0 %v2370_v21  ;;  %v1617_v16 = vld [vmem:[%s3246_s3 + $0x1a8] sm:$0xff] }
 0x3f8   :  { %1913 = vmatmul.mubr.msk.f32.vlgmr.msra.gmra.mrb[2].mxu1 %vm23_vm0, %v648_v26  ;;  %2166 = vmatprep.subr.bf16.mxu0 %v2165_v19  ;;  %v1569_v19 = vld [vmem:[%s3246_s3 + $0x28] sm:$0xff] }
 0x3f9   :  { %803 = vmatprep.mubr.f32.mxu1 %v2370_v21  ;;  %2192 = vmatpush1.bf16.msra.mxu1 %v2191_v25  ;;  %v2211_v23 = vpack.c.bf16 %v1569_v19, %v1568_v17  ;;  %v1579_v17 = vld [vmem:[%s3246_s3 + $0x78] sm:$0xff]  ;;  %v1610_v19 = vld [vmem:[%s3246_s3 + $0x170] sm:$0xff] }
 0x3fa   :  { %1908 = vmatmul.mubr.msk.f32.gmra.mrb[6].mxu0 %vm23_vm0, %v431_v27  ;;  %2198 = vmatprep.subr.bf16.mxu1 %v2580_v31  ;;  %v465_v31 = vld [vmem:[%s3245_s2 + $0x108] sm:$0xff] }
 0x3fb   :  { %2168 = vmatpush1.bf16.msra.mxu0 %v2167_v28  ;;  %619 = vmatprep.mubr.f32.mxu0 %v2370_v21  ;;  %v2185_v44 = vpack.c.bf16 %v469_v40, %v465_v31  ;;  %v2215_v31 = vpack.c.bf16 %v1571_v32, %v1570_v30 }
 0x3fc   :  { %1914 = vmatmul.mubr.msk.f32.gmra.mrb[4].mxu1 %vm23_vm0, %v649_v35  ;;  %2170 = vmatprep.subr.bf16.mxu0 %v2169_v29  ;;  %v1619_v29 = vld [vmem:[%s3246_s3 + $0x1b8] sm:$0xff] }
 0x3fd   :  { %962 = vmatprep.mubr.f32.mxu1 %v2370_v21 }
 0x3fe   :  { %1909 = vmatmul.mubr.msk.f32.vlgmr.msra.gmra.mrb[8].mxu0 %vm23_vm0, %v430_v18  ;;  %v2241_v18 = vpack.c.bf16 %v1617_v16, %v1616_v15  ;;  %v1578_v16 = vld [vmem:[%s3246_s3 + $0x70] sm:$0xff] }
 0x3ff   :  { %2172 = vmatpush1.bf16.msra.mxu0 %v2171_v36  ;;  %625 = vmatprep.mubr.f32.mxu0 %v2370_v21  ;;  %v1588_v36 = vld [vmem:[%s3246_s3 + $0xc0] sm:$0xff] }
 0x400   :  { %2174 = vmatprep.subr.bf16.mxu0 %v2173_v37  ;;  %v1589_v37 = vld [vmem:[%s3246_s3 + $0xc8] sm:$0xff] }
 0x402   :  { %1910 = vmatmul.mubr.msk.f32.gmra.mrb[10].mxu0 %vm23_vm0, %v431_v27  ;;  %v2243_v27 = vpack.c.bf16 %v1601_v22, %v1600_v20  ;;  %v1611_v20 = vld [vmem:[%s3246_s3 + $0x178] sm:$0xff]  ;;  %v2231_v22 = vpack.c.bf16 %v1579_v17, %v1578_v16 }
 0x403   :  { %2176 = vmatpush1.bf16.msra.mxu0 %v2175_v42  ;;  %720 = vmatprep.mubr.f32.mxu0 %v2370_v21  ;;  %v2217_v42 = vpack.c.bf16 %v1589_v37, %v1588_v36 }
 0x404   :  { %2186 = vmatprep.subr.bf16.mxu0 %v2185_v44 }
 0x406   :  { %1911 = vmatmul.mubr.msk.f32.vlgmr.msra.gmra.mrb[12].mxu0 %vm23_vm0, %v648_v26  ;;  %v1618_v26 = vld [vmem:[%s3246_s3 + $0x1b0] sm:$0xff] }
 0x407   :  { %726 = vmatprep.mubr.f32.mxu0 %v2370_v21  ;;  %2188 = vmatpush1.bf16.msra.mxu0 %v2187_v48  ;;  %v2245_v33 = vpack.c.bf16 %v1619_v29, %v1618_v26 }
 0x408   :  { %2194 = vmatprep.subr.bf16.mxu0 %v2185_v44  ;;  %v1572_v44 = vld [vmem:[%s3246_s3 + $0x40] sm:$0xff] }
 0x409   :  { %v2219_v55 = vpack.c.bf16 %v1573_v46, %v1572_v44 }
 0x40a   :  { %1912 = vmatmul.mubr.msk.f32.gmra.mrb[14].mxu0 %vm23_vm0, %v649_v35  ;;  %v1603_v35 = vld [vmem:[%s3246_s3 + $0x138] sm:$0xff] }
 0x40b   :  { %885 = vmatprep.mubr.f32.mxu0 %v2370_v21  ;;  %v2247_v40 = vpack.c.bf16 %v1603_v35, %v1602_v34 }
 0x444   :  { %v813_v50 = vpop.permute.xlu1 %812 }
 0x445   :  { %1915 = vmatmul.mubr.msk.f32.vlgmr.msra.gmra.mrb[16].mxu0 %vm816_vm11, %v813_v50  ;;  %1917 = vmatmul.mubr.msk.f32.vlgmr.msra.gmra.mrb[6].mxu1 %vm816_vm11, %v813_v50  ;;  %v1605_v50 = vld [vmem:[%s3246_s3 + $0x148] sm:$0xff] }
 0x446   :  { %891 = vmatprep.mubr.f32.mxu0 %v2370_v21  ;;  %968 = vmatprep.mubr.f32.mxu1 %v2370_v21 }
 0x447   :  { %2196 = vmatpush1.bf16.msra.mxu0 %v2187_v48  ;;  %2200 = vmatpush1.bf16.msra.mxu1 %v2191_v25  ;;  %v1587_v25 = vld [vmem:[%s3246_s3 + $0xb8] sm:$0xff]  ;;  %v2249_v48 = vpack.c.bf16 %v1621_v39, %v1620_v38 }
 0x448   :  { %v815_v51 = vpop.permute.xlu1 %814  ;;  %2202 = vmatprep.subr.bf16.mxu0 %v2201_v57  ;;  %v2213_v28 = vpack.c.bf16 %v1587_v25, %v1586_v24 }
 0x449   :  { %1916 = vmatmul.mubr.msk.f32.gmra.mrb[18].mxu0 %vm816_vm11, %v815_v51  ;;  %1918 = vmatmul.mubr.msk.f32.gmra.mrb[8].mxu1 %vm816_vm11, %v815_v51  ;;  %v1590_v51 = vld [vmem:[%s3246_s3 + $0xd0] sm:$0xff] }
 0x44a   :  { %1047 = vmatprep.mubr.f32.mxu0 %v2370_v21  ;;  %1124 = vmatprep.mubr.f32.mxu1 %v2370_v21 }
 0x44c   :  { %v976_v52 = vpop.permute.xlu1 %975 }
 0x44d   :  { %1919 = vmatmul.mubr.msk.f32.vlgmr.msra.gmra.mrb[20].mxu0 %vm816_vm11, %v976_v52  ;;  %1921 = vmatmul.mubr.msk.f32.vlgmr.msra.gmra.mrb[10].mxu1 %vm816_vm11, %v976_v52  ;;  %v1591_v52 = vld [vmem:[%s3246_s3 + $0xd8] sm:$0xff] }
 0x44e   :  { %1053 = vmatprep.mubr.f32.mxu0 %v2370_v21  ;;  %1130 = vmatprep.mubr.f32.mxu1 %v2370_v21  ;;  %v1613_v21 = vld [vmem:[%s3246_s3 + $0x188] sm:$0xff]  ;;  %v2221_v57 = vpack.c.bf16 %v1591_v52, %v1590_v51 }
 0x44f   :  { %v2233_v59 = vpack.c.bf16 %v1613_v21, %v1612_v56  ;;  %2204 = vmatpush3.bf16.msra.mxu0 %v2203_v60  ;;  %v2251_v56 = vpack.c.bf16 %v1605_v50, %v1604_v47  ;;  %v1574_v21 = vld [vmem:[%s3246_s3 + $0x50] sm:$0xff]  ;;  %v1607_v60 = vld [vmem:[%s3246_s3 + $0x158] sm:$0xff] }
 0x450   :  { %v978_v53 = vpop.permute.xlu1 %977  ;;  %2206 = vmatprep.subr.bf16.mxu0 %v2205_v6  ;;  %v2223_v3 = vpack.c.bf16 %v1575_v58, %v1574_v21  ;;  %v2255_v4 = vpack.c.bf16 %v1607_v60, %v1606_v43  ;;  %v1576_v6 = vld [vmem:[%s3246_s3 + $0x60] sm:$0xff] }
 0x451   :  { %1920 = vmatmul.mubr.msk.f32.gmra.mrb[22].mxu0 %vm816_vm11, %v978_v53  ;;  %1922 = vmatmul.mubr.msk.f32.gmra.mrb[12].mxu1 %vm816_vm11, %v978_v53  ;;  %v1622_v53 = vld [vmem:[%s3246_s3 + $0x1d0] sm:$0xff] }
 0x452   :  { %2234 = vmatprep.subr.bf16.mxu1 %v2233_v59  ;;  %v2253_v59 = vpack.c.bf16 %v1623_v54, %v1622_v53 }
 0x453   :  { %2236 = vmatpush3.bf16.msra.mxu1 %v2235_v2  ;;  %2208 = vmatpush3.bf16.msra.mxu0 %v2207_v10  ;;  %v1625_v2 = vld [vmem:[%s3246_s3 + $0x1e8] sm:$0xff]  ;;  %v1594_v10 = vld [vmem:[%s3246_s3 + $0xf0] sm:$0xff] }
 0x454   :  { %2238 = vmatprep.subr.bf16.mxu1 %v2237_v7  ;;  %2210 = vmatprep.subr.bf16.mxu0 %v2209_v14  ;;  %v1577_v7 = vld [vmem:[%s3246_s3 + $0x68] sm:$0xff]  ;;  %v2257_v49 = vpack.c.bf16 %v1625_v2, %v1624_v1  ;;  %v2259_v14 = vpack.c.bf16 %v1609_v9, %v1608_v8  ;;  %v2229_v15 = vpack.c.bf16 %v1595_v45, %v1594_v10 }
 0x457   :  { %2240 = vmatpush3.bf16.msra.mxu1 %v2239_v13  ;;  %2212 = vmatpush3.bf16.msra.mxu0 %v2211_v23  ;;  %v2227_v13 = vpack.c.bf16 %v1577_v7, %v1576_v6  ;;  %v2263_v23 = vpack.c.bf16 %v1611_v20, %v1610_v19 }
 0x458   :  { %2242 = vmatprep.subr.bf16.mxu1 %v2241_v18  ;;  %2214 = vmatprep.subr.bf16.mxu0 %v2213_v28  ;;  %v2261_v18 = vpack.c.bf16 %v1627_v12, %v1626_v11 }
 0x45b   :  { %2244 = vmatpush3.bf16.msra.mxu1 %v2243_v27  ;;  %2216 = vmatpush3.bf16.msra.mxu0 %v2215_v31 }
 0x45c   :  { %2246 = vmatprep.subr.bf16.mxu1 %v2245_v33  ;;  %2218 = vmatprep.subr.bf16.mxu0 %v2217_v42 }
 0x45f   :  { %2248 = vmatpush3.bf16.msra.mxu1 %v2247_v40  ;;  %2220 = vmatpush3.bf16.msra.mxu0 %v2219_v55 }
 0x460   :  { %2250 = vmatprep.subr.bf16.mxu1 %v2249_v48  ;;  %2222 = vmatprep.subr.bf16.mxu0 %v2221_v57 }
 0x463   :  { %2252 = vmatpush3.bf16.msra.mxu1 %v2251_v56  ;;  %2224 = vmatpush3.bf16.msra.mxu0 %v2223_v3 }
 0x464   :  { %2254 = vmatprep.subr.bf16.mxu1 %v2253_v59  ;;  %2226 = vmatprep.subr.bf16.mxu0 %v2225_v5 }
 0x467   :  { %2256 = vmatpush3.bf16.msra.mxu1 %v2255_v4  ;;  %2228 = vmatpush3.bf16.msra.mxu0 %v2227_v13 }
 0x468   :  { %2258 = vmatprep.subr.bf16.mxu1 %v2257_v49  ;;  %2230 = vmatprep.subr.bf16.mxu0 %v2229_v15 }
 0x46b   :  { %2260 = vmatpush3.bf16.msra.mxu1 %v2259_v14  ;;  %2232 = vmatpush3.bf16.msra.mxu0 %v2231_v22 }
 0x46c   :  { %2262 = vmatprep.subr.bf16.mxu1 %v2261_v18 }
 0x46f   :  { %2264 = vmatpush3.bf16.msra.mxu1 %v2263_v23 }
 0x4c9   :  { %v544_v24 = vpop.f32.mrb[4].mxu0 }
 0x4ca   :  { %v546_v25 = vpop.f32.mrb[5].mxu0  ;;  %v632_v40 = vmul.f32 1.442695, %v544_v24 }
 0x4cb   :  { %v799_v26 = vpop.f32.mrb[2].mxu1  ;;  %v634_v42 = vmul.f32 1.442695, %v546_v25 }
 0x4cc   :  { %v801_v27 = vpop.f32.mrb[3].mxu1  ;;  %2324 = vpow2.f32 %v632_v40 }
 0x4cd   :  { %v550_v28 = vpop.f32.mrb[6].mxu0  ;;  %2326 = vpow2.f32 %v634_v42 }
 0x4ce   :  { %v552_v29 = vpop.f32.mrb[7].mxu0  ;;  %v640_v44 = vmul.f32 1.442695, %v550_v28 }
 0x4cf   :  { %v805_v30 = vpop.f32.mrb[4].mxu1  ;;  %v642_v46 = vmul.f32 1.442695, %v552_v29 }
 0x4d0   :  { %v2880_v32 = vpop.f32.mrb[5].mxu1  ;;  %2328 = vpow2.f32 %v640_v44 }
 0x4d1   :  { %v621_v33 = vpop.f32.mrb[8].mxu0  ;;  %2330 = vpow2.f32 %v642_v46 }
 0x4d2   :  { %v623_v34 = vpop.f32.mrb[9].mxu0  ;;  %v636_v47 = vmul.f32 1.442695, %v621_v33 }
 0x4d3   :  { %v638_v48 = vmul.f32 1.442695, %v623_v34 }
 0x4d4   :  { %2332 = vpow2.f32 %v636_v47 }
 0x4d5   :  { %v627_v35 = vpop.f32.mrb[10].mxu0  ;;  %2334 = vpow2.f32 %v638_v48 }
 0x4d6   :  { %v629_v36 = vpop.f32.mrb[11].mxu0  ;;  %v644_v50 = vmul.f32 1.442695, %v627_v35  ;;  %v2882_v52 = vpop.eup %2324 }
 0x4d7   :  { %v646_v51 = vmul.f32 1.442695, %v629_v36  ;;  %v2884_v53 = vpop.eup %2326  ;;  %v1145_v2 = vmul.f32 0.0, %v2882_v52 }
 0x4d8   :  { %2336 = vpow2.f32 %v644_v50  ;;  %v1146_v6 = vmul.f32 0.0, %v2884_v53 }
 0x4d9   :  { %v722_v37 = vpop.f32.mrb[12].mxu0  ;;  %2338 = vpow2.f32 %v646_v51 }
 0x4da   :  { %v724_v38 = vpop.f32.mrb[13].mxu0  ;;  %v2886_v54 = vpop.eup %2328 }
 0x4db   :  { %v2888_v55 = vpop.eup %2330  ;;  %v1149_v10 = vmul.f32 0.0, %v2886_v54 }
 0x4dc   :  { %v1150_v9 = vmul.f32 0.0, %v2888_v55 }
 0x4dd   :  { %v728_v39 = vpop.f32.mrb[14].mxu0 }
 0x4de   :  { %v730_v31 = vpop.f32.mrb[15].mxu0  ;;  %v2890_v56 = vpop.eup %2332 }
 0x4df   :  { %v2892_v57 = vpop.eup %2334  ;;  %v1147_v3 = vmul.f32 0.0, %v2890_v56 }
 0x4e0   :  { %v1148_v7 = vmul.f32 0.0, %v2892_v57 }
 0x4e2   :  { %v2894_v21 = vpop.eup %2336 }
 0x4e3   :  { %v2896_v59 = vpop.eup %2338  ;;  %v1151_v15 = vmul.f32 0.0, %v2894_v21 }
 0x4e4   :  { %v1152_v14 = vmul.f32 0.0, %v2896_v59 }
 0x518   :  { %v887_v58 = vpop.f32.mrb[16].mxu0  ;;  %v964_v43 = vpop.f32.mrb[6].mxu1 }
 0x519   :  { %v2898_v60 = vmul.f32 %v887_v58, %v722_v37  ;;  %v2900_v61 = vmul.f32 %v964_v43, %v799_v26  ;;  %v889_v62 = vpop.f32.mrb[17].mxu0  ;;  %v966_v1 = vpop.f32.mrb[7].mxu1 }
 0x51a   :  { %v2904_v4 = vmul.f32 %v889_v62, %v724_v38  ;;  %v2906_v5 = vmul.f32 %v966_v1, %v801_v27 }
 0x51b   :  { %v1153_v8 = vadd.f32 %v1145_v2, %v2898_v60  ;;  %v1155_v49 = vadd.f32 %v1147_v3, %v2900_v61 }
 0x51c   :  { %v893_v45 = vpop.f32.mrb[18].mxu0  ;;  %v970_v11 = vpop.f32.mrb[8].mxu1  ;;  %v1154_v12 = vadd.f32 %v1146_v6, %v2904_v4  ;;  %v1156_v13 = vadd.f32 %v1148_v7, %v2906_v5 }
 0x51d   :  { %v2918_v16 = vmul.f32 %v893_v45, %v728_v39  ;;  %v2920_v17 = vmul.f32 %v970_v11, %v805_v30  ;;  %v895_v18 = vpop.f32.mrb[19].mxu0  ;;  %v972_v19 = vpop.f32.mrb[9].mxu1  ;;  %v1177_v20 = vrot.slane %v1153_v8, 7  ;;  %v1179_v22 = vrot.slane %v1155_v49, 7 }
 0x51e   :  { %v2922_v23 = vmul.f32 %v895_v18, %v730_v31  ;;  %v2925_v24 = vmul.f32 %v972_v19, %v2880_v32  ;;  %v1178_v25 = vrot.slane %v1154_v12, 7  ;;  %v1180_v26 = vrot.slane %v1156_v13, 7 }
 0x51f   :  { %v1193_v27 = vmul.f32 %v2882_v52, %v1177_v20  ;;  %v1195_v28 = vmul.f32 %v2890_v56, %v1179_v22  ;;  %v2930_v29 = vadd.f32 %v1149_v10, %v2918_v16  ;;  %v2933_v30 = vadd.f32 %v1151_v15, %v2920_v17 }
 0x520   :  { %v2935_v33 = vpop.f32.mrb[20].mxu0  ;;  %v2937_v34 = vpop.f32.mrb[10].mxu1  ;;  %v1194_v35 = vmul.f32 %v2884_v53, %v1178_v25  ;;  %v1196_v32 = vmul.f32 %v2892_v57, %v1180_v26  ;;  %v1158_v36 = vadd.f32 %v1150_v9, %v2922_v23  ;;  %v1160_v37 = vadd.f32 %v1152_v14, %v2925_v24 }
 0x521   :  { %v1161_v38 = vmul.f32 %v1153_v8, %v2935_v33  ;;  %v1201_v39 = vadd.f32 %v1193_v27, %v2898_v60  ;;  %v1163_v31 = vmul.f32 %v1155_v49, %v2937_v34  ;;  %v1203_v40 = vadd.f32 %v1195_v28, %v2900_v61  ;;  %v2947_v42 = vpop.f32.mrb[21].mxu0  ;;  %v2949_v44 = vpop.f32.mrb[11].mxu1 }
 0x522   :  { %v1162_v46 = vmul.f32 %v1154_v12, %v2947_v42  ;;  %v1202_v47 = vadd.f32 %v1194_v35, %v2904_v4  ;;  %v1164_v48 = vmul.f32 %v1156_v13, %v2949_v44  ;;  %v1204_v50 = vadd.f32 %v1196_v32, %v2906_v5 }
 0x523   :  { %v1209_v51 = vmul.f32 %v1201_v39, %v2935_v33  ;;  %v1225_v58 = vrot.slane %v1201_v39, 7  ;;  %v1211_v43 = vmul.f32 %v1203_v40, %v2937_v34  ;;  %v1227_v62 = vrot.slane %v1203_v40, 7 }
 0x524   :  { %v2957_v1 = vpop.f32.mrb[22].mxu0  ;;  %v2959_v2 = vpop.f32.mrb[12].mxu1  ;;  %v1210_v3 = vmul.f32 %v1202_v47, %v2947_v42  ;;  %v1226_v6 = vrot.slane %v1202_v47, 7  ;;  %v1212_v7 = vmul.f32 %v1204_v50, %v2949_v44  ;;  %v1228_v8 = vrot.slane %v1204_v50, 7 }
 0x525   :  { %v1241_v49 = vmul.f32 %v2882_v52, %v1225_v58  ;;  %v1243_v9 = vmul.f32 %v2890_v56, %v1227_v62  ;;  %v2965_v10 = vpop.f32.mrb[23].mxu0  ;;  %v2967_v45 = vpop.f32.mrb[13].mxu1  ;;  %v1506_v11 = vsel %vm1505_vm12, %v1161_v38, %v1209_v51  ;;  %v1508_v12 = vsel %vm1505_vm12, %v1163_v31, %v1211_v43 }
 0x526   :  { %v1242_v13 = vmul.f32 %v2884_v53, %v1226_v6  ;;  %v1507_v14 = vsel %vm1505_vm12, %v1162_v46, %v1210_v3  ;;  %v1244_v15 = vmul.f32 %v2892_v57, %v1228_v8  ;;  %v1509_v18 = vsel %vm1505_vm12, %v1164_v48, %v1212_v7 }
 0x527   :  { %v1249_v19 = vadd.f32 %v1241_v49, %v2898_v60  ;;  %v1251_v20 = vadd.f32 %v1243_v9, %v2900_v61  ;;  %v2978_v22 = vmul.f32 %v1158_v36, %v2965_v10  ;;  %v1182_v25 = vrot.slane %v1158_v36, 7 }
 0x528   :  { %v1250_v26 = vadd.f32 %v1242_v13, %v2904_v4  ;;  %v1252_v27 = vadd.f32 %v1244_v15, %v2906_v5  ;;  %v2983_v28 = vmul.f32 %v1160_v37, %v2967_v45  ;;  %v1184_v35 = vrot.slane %v1160_v37, 7 }
 0x529   :  { %v1257_v32 = vmul.f32 %v1249_v19, %v2935_v33  ;;  %v1273_v38 = vrot.slane %v1249_v19, 7  ;;  %v1259_v39 = vmul.f32 %v1251_v20, %v2937_v34  ;;  %v1275_v31 = vrot.slane %v1251_v20, 7 }
 0x52a   :  { %v1258_v40 = vmul.f32 %v1250_v26, %v2947_v42  ;;  %v1274_v46 = vrot.slane %v1250_v26, 7  ;;  %v1260_v47 = vmul.f32 %v1252_v27, %v2949_v44  ;;  %v1276_v36 = vrot.slane %v1252_v27, 7 }
 0x52b   :  { %v1289_v48 = vmul.f32 %v2882_v52, %v1273_v38  ;;  %v1515_v50 = vsel %vm1514_vm13, %v1506_v11, %v1257_v32  ;;  %v1291_v51 = vmul.f32 %v2890_v56, %v1275_v31  ;;  %v1517_v37 = vsel %vm1514_vm13, %v1508_v12, %v1259_v39 }
 0x52c   :  { %v1290_v58 = vmul.f32 %v2884_v53, %v1274_v46  ;;  %v1516_v43 = vsel %vm1514_vm13, %v1507_v14, %v1258_v40  ;;  %v1292_v62 = vmul.f32 %v2892_v57, %v1276_v36  ;;  %v1518_v3 = vsel %vm1514_vm13, %v1509_v18, %v1260_v47 }
 0x52d   :  { %v1297_v6 = vadd.f32 %v1289_v48, %v2898_v60  ;;  %v1299_v7 = vadd.f32 %v1291_v51, %v2900_v61  ;;  %v1198_v8 = vmul.f32 %v2888_v55, %v1182_v25  ;;  %v1200_v49 = vmul.f32 %v2896_v59, %v1184_v35 }
 0x52e   :  { %v1298_v9 = vadd.f32 %v1290_v58, %v2904_v4  ;;  %v1300_v11 = vadd.f32 %v1292_v62, %v2906_v5  ;;  %v3005_v12 = vmul.f32 %v2930_v29, %v2957_v1  ;;  %v1181_v13 = vrot.slane %v2930_v29, 7 }
 0x52f   :  { %v1305_v14 = vmul.f32 %v1297_v6, %v2935_v33  ;;  %v1321_v15 = vrot.slane %v1297_v6, 7  ;;  %v1307_v18 = vmul.f32 %v1299_v7, %v2937_v34  ;;  %v1323_v19 = vrot.slane %v1299_v7, 7 }
 0x530   :  { %v1306_v20 = vmul.f32 %v1298_v9, %v2947_v42  ;;  %v1322_v25 = vrot.slane %v1298_v9, 7  ;;  %v1308_v26 = vmul.f32 %v1300_v11, %v2949_v44  ;;  %v1324_v27 = vrot.slane %v1300_v11, 7 }
 0x531   :  { %v1337_v35 = vmul.f32 %v2882_v52, %v1321_v15  ;;  %v1523_v32 = vsel %vm156_vm1, %v1515_v50, %v1305_v14  ;;  %v1339_v38 = vmul.f32 %v2890_v56, %v1323_v19  ;;  %v1525_v29 = vsel %vm156_vm1, %v1517_v37, %v1307_v18 }
 0x532   :  { %v1338_v39 = vmul.f32 %v2884_v53, %v1322_v25  ;;  %v1524_v31 = vsel %vm156_vm1, %v1516_v43, %v1306_v20  ;;  %v1340_v40 = vmul.f32 %v2892_v57, %v1324_v27  ;;  %v1526_v46 = vsel %vm156_vm1, %v1518_v3, %v1308_v26 }
 0x533   :  { %v1345_v47 = vadd.f32 %v1337_v35, %v2898_v60  ;;  %v1347_v36 = vadd.f32 %v1339_v38, %v2900_v61  ;;  %v1206_v48 = vadd.f32 %v1198_v8, %v2922_v23  ;;  %v1208_v50 = vadd.f32 %v1200_v49, %v2925_v24 }
 0x534   :  { %v1346_v51 = vadd.f32 %v1338_v39, %v2904_v4  ;;  %v1348_v37 = vadd.f32 %v1340_v40, %v2906_v5  ;;  %v3027_v58 = vmul.f32 %v2886_v54, %v1181_v13  ;;  %v3031_v43 = vmul.f32 %v2933_v30, %v2959_v2 }
 0x535   :  { %v1353_v62 = vmul.f32 %v1345_v47, %v2935_v33  ;;  %v1369_v3 = vrot.slane %v1345_v47, 7  ;;  %v1355_v6 = vmul.f32 %v1347_v36, %v2937_v34  ;;  %v1371_v7 = vrot.slane %v1347_v36, 7 }
 0x536   :  { %v1354_v8 = vmul.f32 %v1346_v51, %v2947_v42  ;;  %v1370_v49 = vrot.slane %v1346_v51, 7  ;;  %v1356_v9 = vmul.f32 %v1348_v37, %v2949_v44  ;;  %v1372_v11 = vrot.slane %v1348_v37, 7 }
 0x537   :  { %v1385_v14 = vmul.f32 %v2882_v52, %v1369_v3  ;;  %v1532_v13 = vsel %vm1531_vm14, %v1523_v32, %v1353_v62  ;;  %v1387_v15 = vmul.f32 %v2890_v56, %v1371_v7  ;;  %v1534_v18 = vsel %vm1531_vm14, %v1525_v29, %v1355_v6 }
 0x538   :  { %v1386_v19 = vmul.f32 %v2884_v53, %v1370_v49  ;;  %v1533_v20 = vsel %vm1531_vm14, %v1524_v31, %v1354_v8  ;;  %v1388_v25 = vmul.f32 %v2892_v57, %v1372_v11  ;;  %v1535_v26 = vsel %vm1531_vm14, %v1526_v46, %v1356_v9 }
 0x539   :  { %v1393_v27 = vadd.f32 %v1385_v14, %v2898_v60  ;;  %v1395_v35 = vadd.f32 %v1387_v15, %v2900_v61  ;;  %v1214_v38 = vmul.f32 %v1206_v48, %v2965_v10  ;;  %v1230_v39 = vrot.slane %v1206_v48, 7 }
 0x53a   :  { %v1394_v32 = vadd.f32 %v1386_v19, %v2904_v4  ;;  %v1396_v40 = vadd.f32 %v1388_v25, %v2906_v5  ;;  %v1216_v29 = vmul.f32 %v1208_v50, %v2967_v45  ;;  %v1232_v47 = vrot.slane %v1208_v50, 7 }
 0x53b   :  { %v1401_v31 = vmul.f32 %v1393_v27, %v2935_v33  ;;  %v1417_v36 = vrot.slane %v1393_v27, 7  ;;  %v1403_v51 = vmul.f32 %v1395_v35, %v2937_v34  ;;  %v1419_v46 = vrot.slane %v1395_v35, 7 }
 0x53c   :  { %v1402_v37 = vmul.f32 %v1394_v32, %v2947_v42  ;;  %v1418_v62 = vrot.slane %v1394_v32, 7  ;;  %v1404_v3 = vmul.f32 %v1396_v40, %v2949_v44  ;;  %v1420_v6 = vrot.slane %v1396_v40, 7 }
 0x53d   :  { %v1433_v48 = vmul.f32 %v2882_v52, %v1417_v36  ;;  %v1540_v7 = vsel %vm187_vm2, %v1532_v13, %v1401_v31  ;;  %v1435_v8 = vmul.f32 %v2890_v56, %v1419_v46  ;;  %v1542_v50 = vsel %vm187_vm2, %v1534_v18, %v1403_v51 }
 0x53e   :  { %v1434_v49 = vmul.f32 %v2884_v53, %v1418_v62  ;;  %v1541_v9 = vsel %vm187_vm2, %v1533_v20, %v1402_v37  ;;  %v1436_v11 = vmul.f32 %v2892_v57, %v1420_v6  ;;  %v1543_v14 = vsel %vm187_vm2, %v1535_v26, %v1404_v3 }
 0x53f   :  { %v1441_v15 = vadd.f32 %v1433_v48, %v2898_v60  ;;  %v1443_v19 = vadd.f32 %v1435_v8, %v2900_v61  ;;  %v1246_v25 = vmul.f32 %v2888_v55, %v1230_v39  ;;  %v1511_v13 = vsel %vm1505_vm12, %v2978_v22, %v1214_v38 }
 0x540   :  { %v1442_v27 = vadd.f32 %v1434_v49, %v2904_v4  ;;  %v1444_v18 = vadd.f32 %v1436_v11, %v2906_v5  ;;  %v1248_v35 = vmul.f32 %v2896_v59, %v1232_v47  ;;  %v1513_v20 = vsel %vm1505_vm12, %v2983_v28, %v1216_v29 }
 0x541   :  { %v1449_v26 = vmul.f32 %v1441_v15, %v2935_v33  ;;  %v1465_v32 = vrot.slane %v1441_v15, 7  ;;  %v1451_v40 = vmul.f32 %v1443_v19, %v2937_v34  ;;  %v1467_v31 = vrot.slane %v1443_v19, 7 }
 0x542   :  { %v1450_v39 = vmul.f32 %v1442_v27, %v2947_v42  ;;  %v1466_v36 = vrot.slane %v1442_v27, 7  ;;  %v1452_v22 = vmul.f32 %v1444_v18, %v2949_v44  ;;  %v1468_v38 = vrot.slane %v1444_v18, 7 }
 0x543   :  { %v1481_v51 = vmul.f32 %v2882_v52, %v1465_v32  ;;  %v1548_v46 = vsel %vm174_vm4, %v1540_v7, %v1449_v26  ;;  %v1483_v47 = vmul.f32 %v2890_v56, %v1467_v31  ;;  %v1550_v28 = vsel %vm174_vm4, %v1542_v50, %v1451_v40 }
 0x544   :  { %v1482_v29 = vmul.f32 %v2884_v53, %v1466_v36  ;;  %v1549_v37 = vsel %vm174_vm4, %v1541_v9, %v1450_v39  ;;  %v1484_v62 = vmul.f32 %v2892_v57, %v1468_v38  ;;  %v1551_v3 = vsel %vm174_vm4, %v1543_v14, %v1452_v22 }
 0x545   :  { %v1489_v6 = vadd.f32 %v1481_v51, %v2898_v60  ;;  %v1491_v48 = vadd.f32 %v1483_v47, %v2900_v61  ;;  %v1254_v52 = vadd.f32 %v1246_v25, %v2922_v23  ;;  %v1256_v7 = vadd.f32 %v1248_v35, %v2925_v24 }
 0x546   :  { %v1490_v56 = vadd.f32 %v1482_v29, %v2904_v4  ;;  %v1492_v8 = vadd.f32 %v1484_v62, %v2906_v5  ;;  %v1205_v53 = vadd.f32 %v3027_v58, %v2918_v16  ;;  %v1183_v50 = vrot.slane %v2933_v30, 7 }
 0x547   :  { %v1497_v57 = vmul.f32 %v1489_v6, %v2935_v33  ;;  %v1499_v49 = vmul.f32 %v1491_v48, %v2937_v34  ;;  %v1262_v60 = vmul.f32 %v1254_v52, %v2965_v10  ;;  %v1278_v61 = vrot.slane %v1254_v52, 7 }
 0x548   :  { %v1498_v9 = vmul.f32 %v1490_v56, %v2947_v42  ;;  %v1500_v11 = vmul.f32 %v1492_v8, %v2949_v44  ;;  %v1264_v4 = vmul.f32 %v1256_v7, %v2967_v45  ;;  %v1280_v14 = vrot.slane %v1256_v7, 7 }
 0x549   :  { %v1556_v5 = vsel %vm161_vm3, %v1548_v46, %v1497_v57  ;;  %v1558_v58 = vsel %vm161_vm3, %v1550_v28, %v1499_v49  ;;  %v1294_v30 = vmul.f32 %v2888_v55, %v1278_v61  ;;  %v1520_v33 = vsel %vm1514_vm13, %v1511_v13, %v1262_v60 }
 0x54a   :  { %v1557_v34 = vsel %vm161_vm3, %v1549_v37, %v1498_v9  ;;  %v1559_v15 = vsel %vm161_vm3, %v1551_v3, %v1500_v11  ;;  %v1296_v19 = vmul.f32 %v2896_v59, %v1280_v14  ;;  %v1522_v42 = vsel %vm1514_vm13, %v1513_v20, %v1264_v4 }
 0x54b   :  { %1698 = vmatprep.mubr.f32.mxu0 %v1557_v34  ;;  %1773 = vmatprep.mubr.f32.mxu1 %v1559_v15  ;;  %v1302_v44 = vadd.f32 %v1294_v30, %v2922_v23  ;;  %v1213_v25 = vmul.f32 %v1205_v53, %v2957_v1  ;;  %v1229_v27 = vrot.slane %v1205_v53, 7  ;;  %v1199_v18 = vmul.f32 %v2894_v21, %v1183_v50 }
 0x54c   :  { %1699 = vmatmul.mubr.f32.vlgmr.msra.gmra.mrb[24].mxu0 %v1556_v5  ;;  %1774 = vmatmul.mubr.f32.vlgmr.msra.gmra.mrb[14].mxu1 %v1558_v58  ;;  %v1304_v13 = vadd.f32 %v1296_v19, %v2925_v24 }
 0x54d   :  { %v1310_v35 = vmul.f32 %v1302_v44, %v2965_v10  ;;  %v1326_v26 = vrot.slane %v1302_v44, 7  ;;  %v1245_v32 = vmul.f32 %v2886_v54, %v1229_v27  ;;  %v1510_v20 = vsel %vm1505_vm12, %v3005_v12, %v1213_v25 }
 0x54e   :  { %v1312_v40 = vmul.f32 %v1304_v13, %v2967_v45  ;;  %v1328_v31 = vrot.slane %v1304_v13, 7  ;;  %v1207_v39 = vadd.f32 %v1199_v18, %v2920_v17 }
 0x54f   :  { %v1342_v36 = vmul.f32 %v2888_v55, %v1326_v26  ;;  %v1528_v22 = vsel %vm156_vm1, %v1520_v33, %v1310_v35  ;;  %v1253_v38 = vadd.f32 %v1245_v32, %v2918_v16 }
 0x550   :  { %v1344_v51 = vmul.f32 %v2896_v59, %v1328_v31  ;;  %v1530_v46 = vsel %vm156_vm1, %v1522_v42, %v1312_v40  ;;  %v1215_v47 = vmul.f32 %v1207_v39, %v2959_v2  ;;  %v1231_v28 = vrot.slane %v1207_v39, 7 }
 0x551   :  { %v1350_v12 = vadd.f32 %v1342_v36, %v2922_v23  ;;  %v1261_v29 = vmul.f32 %v1253_v38, %v2957_v1  ;;  %v1277_v37 = vrot.slane %v1253_v38, 7 }
 0x552   :  { %v1352_v62 = vadd.f32 %v1344_v51, %v2925_v24  ;;  %v1247_v3 = vmul.f32 %v2894_v21, %v1231_v28  ;;  %v1512_v6 = vsel %vm1505_vm12, %v3031_v43, %v1215_v47 }
 0x553   :  { %v1358_v48 = vmul.f32 %v1350_v12, %v2965_v10  ;;  %v1374_v52 = vrot.slane %v1350_v12, 7  ;;  %v1293_v7 = vmul.f32 %v2886_v54, %v1277_v37  ;;  %v1519_v56 = vsel %vm1514_vm13, %v1510_v20, %v1261_v29 }
 0x554   :  { %v1360_v8 = vmul.f32 %v1352_v62, %v2967_v45  ;;  %v1376_v53 = vrot.slane %v1352_v62, 7  ;;  %v1255_v50 = vadd.f32 %v1247_v3, %v2920_v17 }
 0x555   :  { %v1390_v57 = vmul.f32 %v2888_v55, %v1374_v52  ;;  %v1537_v49 = vsel %vm1531_vm14, %v1528_v22, %v1358_v48  ;;  %v1301_v60 = vadd.f32 %v1293_v7, %v2918_v16 }
 0x556   :  { %v1392_v43 = vmul.f32 %v2896_v59, %v1376_v53  ;;  %v1539_v61 = vsel %vm1531_vm14, %v1530_v46, %v1360_v8  ;;  %v1263_v9 = vmul.f32 %v1255_v50, %v2959_v2  ;;  %v1279_v11 = vrot.slane %v1255_v50, 7 }
 0x557   :  { %v1398_v4 = vadd.f32 %v1390_v57, %v2922_v23  ;;  %v1309_v14 = vmul.f32 %v1301_v60, %v2957_v1  ;;  %v1325_v5 = vrot.slane %v1301_v60, 7 }
 0x558   :  { %v1400_v58 = vadd.f32 %v1392_v43, %v2925_v24  ;;  %v1295_v30 = vmul.f32 %v2894_v21, %v1279_v11  ;;  %v1521_v33 = vsel %vm1514_vm13, %v1512_v6, %v1263_v9 }
 0x559   :  { %v1406_v34 = vmul.f32 %v1398_v4, %v2965_v10  ;;  %v1422_v15 = vrot.slane %v1398_v4, 7  ;;  %v1341_v19 = vmul.f32 %v2886_v54, %v1325_v5  ;;  %v1527_v42 = vsel %vm156_vm1, %v1519_v56, %v1309_v14 }
 0x55a   :  { %v1408_v44 = vmul.f32 %v1400_v58, %v2967_v45  ;;  %v1424_v25 = vrot.slane %v1400_v58, 7  ;;  %v1303_v27 = vadd.f32 %v1295_v30, %v2920_v17 }
 0x55b   :  { %v1438_v18 = vmul.f32 %v2888_v55, %v1422_v15  ;;  %v1545_v13 = vsel %vm187_vm2, %v1537_v49, %v1406_v34  ;;  %v1349_v35 = vadd.f32 %v1341_v19, %v2918_v16 }
 0x55c   :  { %v1440_v26 = vmul.f32 %v2896_v59, %v1424_v25  ;;  %v1547_v32 = vsel %vm187_vm2, %v1539_v61, %v1408_v44  ;;  %v1311_v20 = vmul.f32 %v1303_v27, %v2959_v2  ;;  %v1327_v40 = vrot.slane %v1303_v27, 7 }
 0x55d   :  { %v1446_v31 = vadd.f32 %v1438_v18, %v2922_v23  ;;  %v1357_v39 = vmul.f32 %v1349_v35, %v2957_v1  ;;  %v1373_v36 = vrot.slane %v1349_v35, 7 }
 0x55e   :  { %v1448_v22 = vadd.f32 %v1440_v26, %v2925_v24  ;;  %v1343_v38 = vmul.f32 %v2894_v21, %v1327_v40  ;;  %v1529_v51 = vsel %vm156_vm1, %v1521_v33, %v1311_v20  ;;  %v1630_v20 = vsub.s32 3, %v2458_v41  ;;  %v2340_v40 = vld [vmem:[%s3244_s1 + $0xe0] sm:$0xff] }
 0x55f   :  { %v1454_v46 = vmul.f32 %v1446_v31, %v2965_v10  ;;  %v1470_v47 = vrot.slane %v1446_v31, 7  ;;  %v1389_v28 = vmul.f32 %v2886_v54, %v1373_v36  ;;  %v1536_v12 = vsel %vm1531_vm14, %v1527_v42, %v1357_v39 }
 0x560   :  { %v1456_v29 = vmul.f32 %v1448_v22, %v2967_v45  ;;  %v1472_v37 = vrot.slane %v1448_v22, 7  ;;  %v1351_v62 = vadd.f32 %v1343_v38, %v2920_v17  ;;  %v1631_v31 = vrot.slane %v2340_v40, %v1630_v20 }
 0x561   :  { %v1486_v3 = vmul.f32 %v2888_v55, %v1470_v47  ;;  %v1553_v6 = vsel %vm174_vm4, %v1545_v13, %v1454_v46  ;;  %v1397_v48 = vadd.f32 %v1389_v28, %v2918_v16 }
 0x562   :  { %v1488_v52 = vmul.f32 %v2896_v59, %v1472_v37  ;;  %v1555_v7 = vsel %vm174_vm4, %v1547_v32, %v1456_v29  ;;  %v1359_v56 = vmul.f32 %v1351_v62, %v2959_v2  ;;  %v1375_v8 = vrot.slane %v1351_v62, 7  ;;  %v1787_v29 = vpop.permute.xlu1 %1786 }
 0x563   :  { %v1494_v53 = vadd.f32 %v1486_v3, %v2922_v23  ;;  %v1405_v50 = vmul.f32 %v1397_v48, %v2957_v1  ;;  %v1421_v57 = vrot.slane %v1397_v48, 7  ;;  %v1633_v48 = vmul.f32 %v1631_v31, %v2512_v0  ;;  %v2341_v0 = vld [vmem:[%s3243_s0 + $0x8] sm:$0xff] }
 0x564   :  { %v1496_v49 = vadd.f32 %v1488_v52, %v2925_v24  ;;  %v1391_v55 = vmul.f32 %v2894_v21, %v1375_v8  ;;  %v1538_v60 = vsel %vm1531_vm14, %v1529_v51, %v1359_v56  ;;  %v1632_v51 = vmul.f32 %v1631_v31, %v2510_v63 }
 0x565   :  { %v1502_v43 = vmul.f32 %v1494_v53, %v2965_v10  ;;  %v1437_v59 = vmul.f32 %v2886_v54, %v1421_v57  ;;  %v1544_v61 = vsel %vm187_vm2, %v1536_v12, %v1405_v50  ;;  %v1800_v57 = vsub.s32 4, %v2458_v41 }
 0x566   :  { %v1504_v9 = vmul.f32 %v1496_v49, %v2967_v45  ;;  %v1399_v11 = vadd.f32 %v1391_v55, %v2920_v17  ;;  %v1789_v50 = vpop.permute.xlu1 %1788 }
 0x567   :  { %v1561_v23 = vsel %vm161_vm3, %v1553_v6, %v1502_v43  ;;  %v1445_v4 = vadd.f32 %v1437_v59, %v2918_v16  ;;  %v1801_v49 = vrot.slane %v2340_v40, %v1800_v57 }
 0x568   :  { %1703 = vmatprep.mubr.f32.mxu0 %v1561_v23  ;;  %v1563_v24 = vsel %vm161_vm3, %v1555_v7, %v1504_v9  ;;  %v1407_v14 = vmul.f32 %v1399_v11, %v2959_v2  ;;  %v1423_v5 = vrot.slane %v1399_v11, 7  ;;  %v2342_v9 = vld [vmem:[%s3243_s0] sm:$0xff] }
 0x569   :  { %1778 = vmatprep.mubr.f32.mxu1 %v1563_v24  ;;  %v1453_v10 = vmul.f32 %v1445_v4, %v2957_v1  ;;  %v1469_v58 = vrot.slane %v1445_v4, 7 }
 0x56a   :  { %v1439_v30 = vmul.f32 %v2894_v21, %v1423_v5  ;;  %v1546_v45 = vsel %vm187_vm2, %v1538_v60, %v1407_v14 }
 0x56b   :  { %v1485_v33 = vmul.f32 %v2886_v54, %v1469_v58  ;;  %v1552_v34 = vsel %vm174_vm4, %v1544_v61, %v1453_v10 }
 0x56c   :  { %v1447_v15 = vadd.f32 %v1439_v30, %v2920_v17 }
 0x56d   :  { %v1493_v19 = vadd.f32 %v1485_v33, %v2918_v16  ;;  %v1794_v16 = vld [vmem:[%s3244_s1 + $0xc0] sm:$0xff] }
 0x56e   :  { %v1455_v42 = vmul.f32 %v1447_v15, %v2959_v2  ;;  %v1471_v44 = vrot.slane %v1447_v15, 7 }
 0x56f   :  { %v1501_v25 = vmul.f32 %v1493_v19, %v2957_v1 }
 0x570   :  { %v1487_v27 = vmul.f32 %v2894_v21, %v1471_v44  ;;  %v1554_v18 = vsel %vm174_vm4, %v1546_v45, %v1455_v42  ;;  %v1795_v21 = vld [vmem:[%s3244_s1 + $0xc8] sm:$0xff] }
 0x571   :  { %v1560_v13 = vsel %vm161_vm3, %v1552_v34, %v1501_v25  ;;  %v2265_v1 = vpack.c.bf16 %v1795_v21, %v1794_v16 }
 0x572   :  { %1704 = vmatmul.mubr.f32.gmra.mrb[26].mxu0 %v1560_v13  ;;  %v1495_v54 = vadd.f32 %v1487_v27, %v2920_v17  ;;  %v1796_v17 = vld [vmem:[%s3244_s1 + $0xd0] sm:$0xff] }
 0x573   :  { %2266 = vmatprep.subr.bf16.mxu0 %v2265_v1 }
 0x574   :  { %v1503_v35 = vmul.f32 %v1495_v54, %v2959_v2  ;;  %2268 = vmatpush3.bf16.msra.mxu0 %v2265_v1  ;;  %v1797_v2 = vld [vmem:[%s3244_s1 + $0xd8] sm:$0xff]  ;;  %s2372_s1 = smov [#allocation2]  }
 0x575   :  { %v2269_v32 = vpack.c.bf16 %v1797_v2, %v1796_v17  ;;  %s1892_s25 = sshll.u32 %s2372_s1, 4  ;;  %s1893_s25 = int_to_ptr.vmem [resolvable:$true] %s1892_s25 }
 0x576   :  { %v1562_v26 = vsel %vm161_vm3, %v1554_v18, %v1503_v35  ;;  %s2343_s30 = scalar_lea.vmem %s1893_s25, 256  ;;  %p2348_p1 = scmp.lt.s32.totalorder %s1893_s25, %s1893_s25 }
 0x577   :  { %1779 = vmatmul.mubr.f32.gmra.mrb[16].mxu1 %v1562_v26  ;;  %2270 = vmatprep.subr.bf16.mxu0 %v2269_v32  ;;  %p2344_p0 = scmp.ne.s32.totalorder %s1893_s25, %s2343_s30  ;;  %p2349_p2 = scmp.lt.s32.totalorder %s2343_s30, %s2343_s30 }
 0x578   :  { %2272 = vmatpush3.bf16.msra.mxu0 %v2269_v32 }
 0x579   :  { %p2350_p3 = por %p2349_p2, %p2348_p1 }
 0x57b   :  { %p2351_p4 = pnand %p2350_p3, %p2344_p0 }
 0x61f   :  { %v1987_v39 = vpop.f32.mrb[24].mxu0  ;;  %v2025_v36 = vpop.f32.mrb[14].mxu1 }
 0x620   :  { %v1988_v22 = vpop.f32.mrb[25].mxu0  ;;  %v2026_v38 = vpop.f32.mrb[15].mxu1 }
 0x621   :  { %v1989_v46 = vadd.f32 %v1988_v22, %v1987_v39  ;;  %v2027_v47 = vadd.f32 %v2026_v38, %v2025_v36 }
 0x623   :  { %v1701_v28 = vadd.f32 %v1989_v46, %v1632_v51 }
 0x625   :  { %v1776_v12 = vadd.f32 %v2027_v47, %v1701_v28 }
 0x627   :  { %v1792_v37 = vmul.f32 %v1787_v29, %v1776_v12 }
 0x629   :  { %2102 = vmatprep.mubr.msk.f32.mxu0 %vm23_vm0, %v1792_v37 }
 0x645   :  { %v1990_v62 = vpop.f32.mrb[26].mxu0 }
 0x646   :  { %v1991_v3 = vpop.f32.mrb[27].mxu0 }
 0x647   :  { %v1992_v6 = vadd.f32 %v1991_v3, %v1990_v62 }
 0x649   :  { %v1706_v7 = vadd.f32 %v1992_v6, %v1633_v48 }
 0x64a   :  { %v2028_v52 = vpop.f32.mrb[16].mxu1 }
 0x64b   :  { %v2029_v56 = vpop.f32.mrb[17].mxu1 }
 0x64c   :  { %v2030_v8 = vadd.f32 %v2029_v56, %v2028_v52 }
 0x64e   :  { %v1781_v53 = vadd.f32 %v2030_v8, %v1706_v7 }
 0x650   :  { %v1793_v63 = vmul.f32 %v1789_v50, %v1781_v53 }
 0x652   :  { %2103 = vmatmul.mubr.msk.f32.vlgmr.msra.gmra.mrb[28].mxu0 %vm23_vm0, %v1793_v63 }
 0x725   :  { %v2104_v55 = vpop.f32.mrb[28].mxu0 }
 0x726   :  { %v1880_v60 = vadd.f32 %v2104_v55, %v1801_v49  ;;  %v1874_v43 = vpop.f32.mrb[29].mxu0 }
 0x727   :  { %v1875_v59 = vadd.f32 %v1874_v43, %v1801_v49 }
 0x728   :  { %v1884_v61 = vadd.f32 %v2341_v0, %v1880_v60 }
 0x729   :  { %v1883_v11 = vadd.f32 %v2342_v9, %v1875_v59 }
 0x72a   :  { %1886 = vst.msk [vmem:[#allocation2 + $0x8] sm:$0xff] %vm23_vm0, %v1884_v61 }
 0x72b   :  { %1885 = vst.msk [vmem:[#allocation2] sm:$0xff] %vm23_vm0, %v1883_v11 }
 0x72c   :  { %2354 = shalt.err (!%p2351_p4)
}
 0x72d   :  { %s2355_s7 = scalar_lea.hbm %s3247_s4, 256 }
 0x72e   :  { %p2356_p5 = scmp.ne.s32.totalorder %s3247_s4, %s2355_s7  ;;  %p2359_p6 = scmp.lt.u32.totalorder %s2355_s7, %s3247_s4 }
 0x730   :  { %p2361_p7 = pnand %p2359_p6, %p2356_p5 }
 0x732   :  { %2364 = shalt.err (!%p2361_p7)
}
 0x733   :  { %s2373_s12 = smov 128   ;;  %s2374_s13 = smov 8  }
 0x734   :  { %1898 = dma.vmem_to_hbm [thread:$0]  %s1893_s25, 256, %s3247_s4, [#allocation3], %s2373_s12, %s2373_s12, %s2374_s13  }
 0x735   :  { %2365 = dma.done.wait [#allocation3], 256  }
 0x736   :  { %2366 = vsyncadd [#allocation3], 4294967040 }
 0x737   :  { %1902 = vsyncpa [#allocation3], 1 }

</bundles_post_ra>
